<compile_context>
chip_gen: v6e
topology: v6e:2x2x1
jax: 0.10.0
libtpu: 0.0.40
codegen_flags: <defaults>
</compile_context>

<pallas_src>
import functools
import math
import warnings

import jax
import jax.numpy as jnp
from jax.experimental import pallas as pl
from jax.experimental.pallas import tpu as pltpu

_CONST = -0.5 * math.log(2.0 * math.pi)
_MAX_ROW_TILE = 4096   # absolute cap on the row tile (sublane dimension)


# ---------------------------------------------------------------------------
# Hardware sizing (generation specific)
# ---------------------------------------------------------------------------
@functools.lru_cache(maxsize=1)
def _tpu_params():
    """Returns (physical_vmem, sizing_budget, base_vmem_limit, dual_tensorcore)."""
    kind = ""
    try:
        kind = jax.devices()[0].device_kind.lower()
    except Exception:
        pass
    if "v7" in kind:
        # v7x: 64 MiB physical VMEM per TensorCore, 2 TCs per chip.
        return 64 << 20, 20 << 20, 40 << 20, True
    if ("v5" in kind) or ("v6" in kind):
        # v5e / v6e: 128 MiB physical VMEM, single TensorCore.
        return 128 << 20, 48 << 20, 96 << 20, False
    # Unknown / older generation: conservative settings that fit everywhere.
    return 64 << 20, 20 << 20, 40 << 20, False


def _vmem_limited_rows(lane_width, n_in_blocks, n_temp_tiles, in_itemsize,
                       budget):
    """Max row tile such that double-buffered blocks + live f32 temporaries fit
    within the sizing budget.  Returns (rows, per_row_bytes)."""
    lw = ((lane_width + 127) // 128) * 128          # vreg lane padding
    per_row = lw * (2 * n_in_blocks * in_itemsize   # inputs, double buffered
                    + 2 * 4                         # f32 output, double buffered
                    + n_temp_tiles * 4)             # live f32 temporaries
    rows = min(budget // max(per_row, 1), _MAX_ROW_TILE)
    return max(8, (rows // 8) * 8), per_row


def _pick_row_tile(n_rows, max_rows, dual_core):
    """Row-tile size; the grid is pl.cdiv(n_rows, tile) with a ragged last
    block (no padding pass; OOB writes are dropped by Pallas)."""
    if n_rows <= 8:
        return n_rows                              # tiny full-extent block
    max_rows = max(8, max_rows)
    if n_rows <= max_rows:
        if dual_core and n_rows >= 16:
            # Split in two so both v7x TensorCores get one block each.
            return ((n_rows + 15) // 16) * 8
        return n_rows                              # single full-extent block
    tile = max_rows                                # multiple of 8
    if dual_core:
        g = pl.cdiv(n_rows, tile)
        if g % 2:                                  # prefer an even grid on v7x
            t = ((pl.cdiv(n_rows, g + 1) + 7) // 8) * 8
            if t >= 8 and pl.cdiv(n_rows, t) % 2 == 0:
                tile = t
    return tile


def _vmem_limit(tile, per_row, base_limit, phys):
    # Raise the scoped limit if the (>=8-row) tile needs it; keep headroom for
    # Mosaic internal scratch and never exceed physical VMEM.
    needed = tile * per_row + (2 << 20)
    return int(min(max(base_limit, needed), phys - (8 << 20)))


def _warn_lanes(lw):
    if lw % 128 != 0:
        warnings.warn(
            f"GaussianMixtureNLL Pallas kernel: last-dim width {lw} is not a "
            "multiple of 128; stores/loads will be lane-masked (slower path).")


# ---------------------------------------------------------------------------
# Kernels
# ---------------------------------------------------------------------------
def _gmm_nll_mixture_kernel(tgt_ref, mean_ref, log_std_ref, log_prior_ref,
                            out_ref):
    """Mixture path (log_prior is not None).

    tgt_ref       : [T, LW]
    mean_ref      : [M, T, LW]    (mixture-major, LW = d_tgt)
    log_std_ref   : [M, T, LW]
    log_prior_ref : [M, T, LW]
    out_ref       : [T, LW] float32 nll

    Two-pass max-then-sum logsumexp over the (small, static) mixture axis:
    the n_mix w tiles stay VMEM-resident, costing 2 exps per mixture element
    instead of 3 and removing the serial running-max dependency chain.
    """
    tgt = tgt_ref[...].astype(jnp.float32)
    n_mix = mean_ref.shape[0]

    ws = []
    for m in range(n_mix):                     # n_mix is small & static
        mu = mean_ref[m].astype(jnp.float32)
        ls = log_std_ref[m].astype(jnp.float32)
        lp = log_prior_ref[m].astype(jnp.float32)
        z = (tgt - mu) * jnp.exp(-ls)          # exp -> EUP, mul -> VALU
        ws.append(lp + (_CONST - ls - 0.5 * z * z))

    w_max = ws[0]
    for w in ws[1:]:
        w_max = jnp.maximum(w_max, w)
    acc = jnp.zeros_like(w_max)
    for w in ws:
        acc = acc + jnp.exp(w - w_max)

    out_ref[...] = -(jnp.log(acc) + w_max)


def _gauss_nll_elementwise_kernel(tgt_ref, mean_ref, log_std_ref, out_ref):
    """No-prior path: per-component Gaussian NLL, fully elementwise.

    All refs are [T, LW]; target has already been broadcast/interleaved to the
    same layout as mean/log_std (wrapper handles n_mix > 1).
    """
    tgt = tgt_ref[...].astype(jnp.float32)
    mu = mean_ref[...].astype(jnp.float32)
    ls = log_std_ref[...].astype(jnp.float32)
    z = (tgt - mu) * jnp.exp(-ls)
    out_ref[...] = -(_CONST - ls - 0.5 * z * z)


# ---------------------------------------------------------------------------
# pallas_call drivers (canonical 2D layouts)
# ---------------------------------------------------------------------------
def _gmm_nll_core(tgt2, mean3, log_std3, log_prior3):
    """tgt2: [NR, LW]; mixture tensors: [M, NR, LW] (mixture-major).
    Returns nll [NR, LW] float32."""
    n_mix, n_rows, lw = mean3.shape
    _warn_lanes(lw)
    phys, budget, base_limit, dual = _tpu_params()
    in_itemsize = jnp.dtype(mean3.dtype).itemsize
    max_rows, per_row = _vmem_limited_rows(
        lw, 3 * n_mix + 1, n_mix + 6, in_itemsize, budget)
    tile = _pick_row_tile(n_rows, max_rows, dual)
    grid = pl.cdiv(n_rows, tile)

    row_spec = pl.BlockSpec((tile, lw), lambda i: (i, 0))
    mix_spec = pl.BlockSpec((n_mix, tile, lw), lambda i: (0, i, 0))

    return pl.pallas_call(
        _gmm_nll_mixture_kernel,
        out_shape=jax.ShapeDtypeStruct((n_rows, lw), jnp.float32),
        grid=(grid,),
        in_specs=[row_spec, mix_spec, mix_spec, mix_spec],
        out_specs=row_spec,
        compiler_params=pltpu.CompilerParams(
            dimension_semantics=("parallel",),
            vmem_limit_bytes=_vmem_limit(tile, per_row, base_limit, phys)),
    )(tgt2, mean3, log_std3, log_prior3)


def _gauss_nll_core(tgt2, mean2, log_std2):
    """All inputs [NR, LW]; returns per-component nll [NR, LW] float32."""
    n_rows, lw = mean2.shape
    _warn_lanes(lw)
    phys, budget, base_limit, dual = _tpu_params()
    in_itemsize = jnp.dtype(mean2.dtype).itemsize
    max_rows, per_row = _vmem_limited_rows(lw, 3, 6, in_itemsize, budget)
    tile = _pick_row_tile(n_rows, max_rows, dual)
    grid = pl.cdiv(n_rows, tile)

    row_spec = pl.BlockSpec((tile, lw), lambda i: (i, 0))

    return pl.pallas_call(
        _gauss_nll_elementwise_kernel,
        out_shape=jax.ShapeDtypeStruct((n_rows, lw), jnp.float32),
        grid=(grid,),
        in_specs=[row_spec, row_spec, row_spec],
        out_specs=row_spec,
        compiler_params=pltpu.CompilerParams(
            dimension_semantics=("parallel",),
            vmem_limit_bytes=_vmem_limit(tile, per_row, base_limit, phys)),
    )(tgt2, mean2, log_std2)


# ---------------------------------------------------------------------------
# Public API
# ---------------------------------------------------------------------------
def gaussian_mixture_nll_mixture_major(target, mean_mj, log_std_mj,
                                       log_prior_mj):
    """Fast path: mixture tensors already mixture-major, i.e. shaped
    [n_mix, ...(batch), d_tgt].  Only free leading-dim reshapes are needed."""
    batch_shape = target.shape[:-1]
    d_tgt = target.shape[-1]
    n_mix = mean_mj.shape[0]
    r = math.prod(batch_shape) if batch_shape else 1

    nll = _gmm_nll_core(
        target.reshape(r, d_tgt),
        mean_mj.reshape(n_mix, r, d_tgt),
        log_std_mj.reshape(n_mix, r, d_tgt),
        log_prior_mj.reshape(n_mix, r, d_tgt),
    )
    return nll.reshape(*batch_shape, d_tgt)


def gaussian_mixture_nll(target, mean, log_std, log_prior=None):
    """Drop-in equivalent of the PyTorch GaussianMixtureNLL.forward.

    target    : [..., d_tgt]
    mean      : [..., d_tgt, n_mix]
    log_std   : [..., d_tgt, n_mix]
    log_prior : [..., d_tgt, n_mix] or None
    """
    batch_shape = target.shape[:-1]
    d_tgt = target.shape[-1]
    n_mix = mean.shape[-1]
    r = math.prod(batch_shape) if batch_shape else 1

    if log_prior is None:
        if n_mix == 1:
            # Purely elementwise in the native layout -> no extra HBM passes.
            nll = _gauss_nll_core(
                target.reshape(r, d_tgt),
                mean.reshape(r, d_tgt),
                log_std.reshape(r, d_tgt),
            )
            return nll.reshape(*batch_shape, d_tgt)     # torch .squeeze(-1)
        # TODO(synk): build the interleaved target in-kernel (lane expansion)
        # once Mosaic minor-dim reshape support is guaranteed; the wrapper-side
        # repeat below costs one extra write+read of an r*d_tgt*n_mix temp.
        tgt_rep = jnp.repeat(target.reshape(r, d_tgt), n_mix, axis=-1)
        nll = _gauss_nll_core(
            tgt_rep,
            mean.reshape(r, d_tgt * n_mix),
            log_std.reshape(r, d_tgt * n_mix),
        )
        return nll.reshape(*batch_shape, d_tgt, n_mix)

    # Mixture path: the logsumexp over n_mix wants the mixture axis off the
    # TPU lane dimension -> bring tensors to mixture-major [n_mix, R, d_tgt].
    # TODO(synk): emit mixture-major upstream (free weight-column reordering in
    # the producing projection) and call gaussian_mixture_nll_mixture_major to
    # eliminate these HBM transpose passes entirely.
    mean_mj = jnp.moveaxis(mean.reshape(r, d_tgt, n_mix), -1, 0)
    lstd_mj = jnp.moveaxis(log_std.reshape(r, d_tgt, n_mix), -1, 0)
    lpri_mj = jnp.moveaxis(log_prior.reshape(r, d_tgt, n_mix), -1, 0)
    return gaussian_mixture_nll_mixture_major(target, mean_mj, lstd_mj,
                                              lpri_mj)


# ---------------------------------------------------------------------------
# Pure-JAX reference (mirrors the PyTorch forward exactly)
# ---------------------------------------------------------------------------
def _reference(target, mean, log_std, log_prior=None):
    tgt_ = target[..., None].astype(jnp.float32)
    mean = mean.astype(jnp.float32)
    log_std = log_std.astype(jnp.float32)
    log_probs = _CONST - log_std - 0.5 * ((tgt_ - mean) / jnp.exp(log_std)) ** 2
    if log_prior is None:
        if log_probs.shape[-1] == 1:
            log_prob = jnp.squeeze(log_probs, -1)
        else:
            log_prob = log_probs
    else:
        w = log_prior.astype(jnp.float32) + log_probs
        m = jnp.max(w, axis=-1, keepdims=True)
        log_prob = jnp.log(jnp.sum(jnp.exp(w - m), axis=-1)) + m[..., 0]
    return -log_prob


# ---------------------------------------------------------------------------
# Main
# ---------------------------------------------------------------------------
if __name__ == "__main__":
    key = jax.random.PRNGKey(0)
    k1, k2, k3, k4 = jax.random.split(key, 4)

    batch, seq, d_tgt, n_mix = 2, 48, 128, 4     # R = 96 rows

    target = jax.random.normal(k1, (batch, seq, d_tgt), dtype=jnp.float32)
    mean = jax.random.normal(k2, (batch, seq, d_tgt, n_mix), dtype=jnp.float32)
    log_std = 0.1 * jax.random.normal(
        k3, (batch, seq, d_tgt, n_mix), dtype=jnp.float32)
    log_prior = jax.nn.log_softmax(
        jax.random.normal(k4, (batch, seq, d_tgt, n_mix), dtype=jnp.float32),
        axis=-1)

    # 1) Mixture path (log_prior given), PyTorch-layout API.
    nll = jax.block_until_ready(
        gaussian_mixture_nll(target, mean, log_std, log_prior))
    ref = _reference(target, mean, log_std, log_prior)
    assert nll.shape == (batch, seq, d_tgt)
    assert jnp.allclose(nll, ref, atol=1e-5, rtol=1e-5)

    # 2) No-prior path, n_mix == 1 (torch squeeze(-1) semantics).
    nll1 = jax.block_until_ready(
        gaussian_mixture_nll(target, mean[..., :1], log_std[..., :1], None))
    ref1 = _reference(target, mean[..., :1], log_std[..., :1], None)
    assert nll1.shape == (batch, seq, d_tgt)
    assert jnp.allclose(nll1, ref1, atol=1e-5, rtol=1e-5)

    # 3) No-prior path, n_mix > 1 (output keeps the mixture axis).
    nll4 = jax.block_until_ready(
        gaussian_mixture_nll(target, mean, log_std, None))
    ref4 = _reference(target, mean, log_std, None)
    assert nll4.shape == (batch, seq, d_tgt, n_mix)
    assert jnp.allclose(nll4, ref4, atol=1e-5, rtol=1e-5)

    # 4) Mixture-major fast path (recommended upstream layout, no transposes).
    nll_mj = jax.block_until_ready(
        gaussian_mixture_nll_mixture_major(
            target,
            jnp.moveaxis(mean, -1, 0),
            jnp.moveaxis(log_std, -1, 0),
            jnp.moveaxis(log_prior, -1, 0)))
    assert nll_mj.shape == (batch, seq, d_tgt)
    assert jnp.allclose(nll_mj, ref, atol=1e-5, rtol=1e-5)

    print("KERNEL_OK")
</pallas_src>

<mosaic_0001>
module attributes {stable_mosaic.version = 11 : i64} {
  func.func @_gmm_nll_mixture_kernel(%arg0: i32, %arg1: memref<96x128xf32, #tpu.memory_space<vmem>>, %arg2: memref<4x96x128xf32, #tpu.memory_space<vmem>>, %arg3: memref<4x96x128xf32, #tpu.memory_space<vmem>>, %arg4: memref<4x96x128xf32, #tpu.memory_space<vmem>>, %arg5: memref<96x128xf32, #tpu.memory_space<vmem>>) attributes {dimension_semantics = [#tpu.dimension_semantics<parallel>], iteration_bounds = array<i64: 1>, scalar_prefetch = 0 : i64, scratch_operands = 0 : i64, tpu.core_type = #tpu.core_type<tc>, window_params = [{transform_indices = @transform_0, window_bounds = array<i64: 96, 128>}, {transform_indices = @transform_1, window_bounds = array<i64: 4, 96, 128>}, {transform_indices = @transform_2, window_bounds = array<i64: 4, 96, 128>}, {transform_indices = @transform_3, window_bounds = array<i64: 4, 96, 128>}, {transform_indices = @transform_4, window_bounds = array<i64: 96, 128>}]} {
    %c0 = arith.constant 0 : index
    %c0_0 = arith.constant 0 : index
    %0 = vector.load %arg1[%c0, %c0_0] : memref<96x128xf32, #tpu.memory_space<vmem>>, vector<96x128xf32>
    %c0_1 = arith.constant 0 : index
    %c0_2 = arith.constant 0 : index
    %c0_3 = arith.constant 0 : index
    %1 = vector.load %arg2[%c0_1, %c0_2, %c0_3] : memref<4x96x128xf32, #tpu.memory_space<vmem>>, vector<1x96x128xf32>
    %2 = vector.shape_cast %1 : vector<1x96x128xf32> to vector<96x128xf32>
    %c0_4 = arith.constant 0 : index
    %c0_5 = arith.constant 0 : index
    %c0_6 = arith.constant 0 : index
    %3 = vector.load %arg3[%c0_4, %c0_5, %c0_6] : memref<4x96x128xf32, #tpu.memory_space<vmem>>, vector<1x96x128xf32>
    %4 = vector.shape_cast %3 : vector<1x96x128xf32> to vector<96x128xf32>
    %c0_7 = arith.constant 0 : index
    %c0_8 = arith.constant 0 : index
    %c0_9 = arith.constant 0 : index
    %5 = vector.load %arg4[%c0_7, %c0_8, %c0_9] : memref<4x96x128xf32, #tpu.memory_space<vmem>>, vector<1x96x128xf32>
    %6 = vector.shape_cast %5 : vector<1x96x128xf32> to vector<96x128xf32>
    %7 = arith.subf %0, %2 : vector<96x128xf32>
    %cst = arith.constant 0.000000e+00 : f32
    %8 = vector.broadcast %cst : f32 to vector<96x128xf32>
    %9 = arith.subf %8, %4 : vector<96x128xf32>
    %10 = math.exp %9 : vector<96x128xf32>
    %11 = arith.mulf %7, %10 : vector<96x128xf32>
    %cst_10 = arith.constant -0.918938517 : f32
    %12 = vector.broadcast %cst_10 : f32 to vector<96x128xf32>
    %13 = arith.subf %12, %4 : vector<96x128xf32>
    %cst_11 = arith.constant 5.000000e-01 : f32
    %14 = vector.broadcast %cst_11 : f32 to vector<96x128xf32>
    %15 = arith.mulf %14, %11 : vector<96x128xf32>
    %16 = arith.mulf %15, %11 : vector<96x128xf32>
    %17 = arith.subf %13, %16 : vector<96x128xf32>
    %18 = arith.addf %6, %17 : vector<96x128xf32>
    %c1 = arith.constant 1 : index
    %c0_12 = arith.constant 0 : index
    %c0_13 = arith.constant 0 : index
    %19 = vector.load %arg2[%c1, %c0_12, %c0_13] : memref<4x96x128xf32, #tpu.memory_space<vmem>>, vector<1x96x128xf32>
    %20 = vector.shape_cast %19 : vector<1x96x128xf32> to vector<96x128xf32>
    %c1_14 = arith.constant 1 : index
    %c0_15 = arith.constant 0 : index
    %c0_16 = arith.constant 0 : index
    %21 = vector.load %arg3[%c1_14, %c0_15, %c0_16] : memref<4x96x128xf32, #tpu.memory_space<vmem>>, vector<1x96x128xf32>
    %22 = vector.shape_cast %21 : vector<1x96x128xf32> to vector<96x128xf32>
    %c1_17 = arith.constant 1 : index
    %c0_18 = arith.constant 0 : index
    %c0_19 = arith.constant 0 : index
    %23 = vector.load %arg4[%c1_17, %c0_18, %c0_19] : memref<4x96x128xf32, #tpu.memory_space<vmem>>, vector<1x96x128xf32>
    %24 = vector.shape_cast %23 : vector<1x96x128xf32> to vector<96x128xf32>
    %25 = arith.subf %0, %20 : vector<96x128xf32>
    %cst_20 = arith.constant 0.000000e+00 : f32
    %26 = vector.broadcast %cst_20 : f32 to vector<96x128xf32>
    %27 = arith.subf %26, %22 : vector<96x128xf32>
    %28 = math.exp %27 : vector<96x128xf32>
    %29 = arith.mulf %25, %28 : vector<96x128xf32>
    %cst_21 = arith.constant -0.918938517 : f32
    %30 = vector.broadcast %cst_21 : f32 to vector<96x128xf32>
    %31 = arith.subf %30, %22 : vector<96x128xf32>
    %cst_22 = arith.constant 5.000000e-01 : f32
    %32 = vector.broadcast %cst_22 : f32 to vector<96x128xf32>
    %33 = arith.mulf %32, %29 : vector<96x128xf32>
    %34 = arith.mulf %33, %29 : vector<96x128xf32>
    %35 = arith.subf %31, %34 : vector<96x128xf32>
    %36 = arith.addf %24, %35 : vector<96x128xf32>
    %c2 = arith.constant 2 : index
    %c0_23 = arith.constant 0 : index
    %c0_24 = arith.constant 0 : index
    %37 = vector.load %arg2[%c2, %c0_23, %c0_24] : memref<4x96x128xf32, #tpu.memory_space<vmem>>, vector<1x96x128xf32>
    %38 = vector.shape_cast %37 : vector<1x96x128xf32> to vector<96x128xf32>
    %c2_25 = arith.constant 2 : index
    %c0_26 = arith.constant 0 : index
    %c0_27 = arith.constant 0 : index
    %39 = vector.load %arg3[%c2_25, %c0_26, %c0_27] : memref<4x96x128xf32, #tpu.memory_space<vmem>>, vector<1x96x128xf32>
    %40 = vector.shape_cast %39 : vector<1x96x128xf32> to vector<96x128xf32>
    %c2_28 = arith.constant 2 : index
    %c0_29 = arith.constant 0 : index
    %c0_30 = arith.constant 0 : index
    %41 = vector.load %arg4[%c2_28, %c0_29, %c0_30] : memref<4x96x128xf32, #tpu.memory_space<vmem>>, vector<1x96x128xf32>
    %42 = vector.shape_cast %41 : vector<1x96x128xf32> to vector<96x128xf32>
    %43 = arith.subf %0, %38 : vector<96x128xf32>
    %cst_31 = arith.constant 0.000000e+00 : f32
    %44 = vector.broadcast %cst_31 : f32 to vector<96x128xf32>
    %45 = arith.subf %44, %40 : vector<96x128xf32>
    %46 = math.exp %45 : vector<96x128xf32>
    %47 = arith.mulf %43, %46 : vector<96x128xf32>
    %cst_32 = arith.constant -0.918938517 : f32
    %48 = vector.broadcast %cst_32 : f32 to vector<96x128xf32>
    %49 = arith.subf %48, %40 : vector<96x128xf32>
    %cst_33 = arith.constant 5.000000e-01 : f32
    %50 = vector.broadcast %cst_33 : f32 to vector<96x128xf32>
    %51 = arith.mulf %50, %47 : vector<96x128xf32>
    %52 = arith.mulf %51, %47 : vector<96x128xf32>
    %53 = arith.subf %49, %52 : vector<96x128xf32>
    %54 = arith.addf %42, %53 : vector<96x128xf32>
    %c3 = arith.constant 3 : index
    %c0_34 = arith.constant 0 : index
    %c0_35 = arith.constant 0 : index
    %55 = vector.load %arg2[%c3, %c0_34, %c0_35] : memref<4x96x128xf32, #tpu.memory_space<vmem>>, vector<1x96x128xf32>
    %56 = vector.shape_cast %55 : vector<1x96x128xf32> to vector<96x128xf32>
    %c3_36 = arith.constant 3 : index
    %c0_37 = arith.constant 0 : index
    %c0_38 = arith.constant 0 : index
    %57 = vector.load %arg3[%c3_36, %c0_37, %c0_38] : memref<4x96x128xf32, #tpu.memory_space<vmem>>, vector<1x96x128xf32>
    %58 = vector.shape_cast %57 : vector<1x96x128xf32> to vector<96x128xf32>
    %c3_39 = arith.constant 3 : index
    %c0_40 = arith.constant 0 : index
    %c0_41 = arith.constant 0 : index
    %59 = vector.load %arg4[%c3_39, %c0_40, %c0_41] : memref<4x96x128xf32, #tpu.memory_space<vmem>>, vector<1x96x128xf32>
    %60 = vector.shape_cast %59 : vector<1x96x128xf32> to vector<96x128xf32>
    %61 = arith.subf %0, %56 : vector<96x128xf32>
    %cst_42 = arith.constant 0.000000e+00 : f32
    %62 = vector.broadcast %cst_42 : f32 to vector<96x128xf32>
    %63 = arith.subf %62, %58 : vector<96x128xf32>
    %64 = math.exp %63 : vector<96x128xf32>
    %65 = arith.mulf %61, %64 : vector<96x128xf32>
    %cst_43 = arith.constant -0.918938517 : f32
    %66 = vector.broadcast %cst_43 : f32 to vector<96x128xf32>
    %67 = arith.subf %66, %58 : vector<96x128xf32>
    %cst_44 = arith.constant 5.000000e-01 : f32
    %68 = vector.broadcast %cst_44 : f32 to vector<96x128xf32>
    %69 = arith.mulf %68, %65 : vector<96x128xf32>
    %70 = arith.mulf %69, %65 : vector<96x128xf32>
    %71 = arith.subf %67, %70 : vector<96x128xf32>
    %72 = arith.addf %60, %71 : vector<96x128xf32>
    %73 = arith.maximumf %18, %36 : vector<96x128xf32>
    %74 = arith.maximumf %73, %54 : vector<96x128xf32>
    %75 = arith.maximumf %74, %72 : vector<96x128xf32>
    %cst_45 = arith.constant 0.000000e+00 : f32
    %76 = vector.broadcast %cst_45 : f32 to vector<96x128xf32>
    %77 = arith.subf %18, %75 : vector<96x128xf32>
    %78 = math.exp %77 : vector<96x128xf32>
    %79 = arith.addf %76, %78 : vector<96x128xf32>
    %80 = arith.subf %36, %75 : vector<96x128xf32>
    %81 = math.exp %80 : vector<96x128xf32>
    %82 = arith.addf %79, %81 : vector<96x128xf32>
    %83 = arith.subf %54, %75 : vector<96x128xf32>
    %84 = math.exp %83 : vector<96x128xf32>
    %85 = arith.addf %82, %84 : vector<96x128xf32>
    %86 = arith.subf %72, %75 : vector<96x128xf32>
    %87 = math.exp %86 : vector<96x128xf32>
    %88 = arith.addf %85, %87 : vector<96x128xf32>
    %89 = math.log %88 : vector<96x128xf32>
    %90 = arith.addf %89, %75 : vector<96x128xf32>
    %cst_46 = arith.constant 0.000000e+00 : f32
    %91 = vector.broadcast %cst_46 : f32 to vector<96x128xf32>
    %92 = arith.subf %91, %90 : vector<96x128xf32>
    %c0_47 = arith.constant 0 : index
    %c0_48 = arith.constant 0 : index
    %93 = vector.load %arg5[%c0_47, %c0_48] : memref<96x128xf32, #tpu.memory_space<vmem>>, vector<96x128xf32>
    tpu.vector_store %arg5[%c0_47, %c0_48], %92 {strides = array<i32>} : memref<96x128xf32, #tpu.memory_space<vmem>>, vector<96x128xf32>,
    return
  }
  func.func @transform_0(%arg0: i32) -> (i32, i32) {
    %c0_i32 = arith.constant 0 : i32
    %c0_i32_0 = arith.constant 0 : i32
    return %arg0, %c0_i32 : i32, i32
  }
  func.func @transform_1(%arg0: i32) -> (i32, i32, i32) {
    %c0_i32 = arith.constant 0 : i32
    %c0_i32_0 = arith.constant 0 : i32
    %c0_i32_1 = arith.constant 0 : i32
    return %c0_i32, %arg0, %c0_i32_0 : i32, i32, i32
  }
  func.func @transform_2(%arg0: i32) -> (i32, i32, i32) {
    %c0_i32 = arith.constant 0 : i32
    %c0_i32_0 = arith.constant 0 : i32
    %c0_i32_1 = arith.constant 0 : i32
    return %c0_i32, %arg0, %c0_i32_0 : i32, i32, i32
  }
  func.func @transform_3(%arg0: i32) -> (i32, i32, i32) {
    %c0_i32 = arith.constant 0 : i32
    %c0_i32_0 = arith.constant 0 : i32
    %c0_i32_1 = arith.constant 0 : i32
    return %c0_i32, %arg0, %c0_i32_0 : i32, i32, i32
  }
  func.func @transform_4(%arg0: i32) -> (i32, i32) {
    %c0_i32 = arith.constant 0 : i32
    %c0_i32_0 = arith.constant 0 : i32
    return %arg0, %c0_i32 : i32, i32
  }
}

</mosaic_0001>

<bundles_post_ra>
// kernel: tpu_custom_call.1
= control target key start
LH: loop header
LB: loop body
LE: loop exit
PB: predicated region body
PF: predicated region fallthrough
CT: control target
= control target key end

     0   :  { %9 = vsyncpa [#allocation3], 0  ;;  %s2428_s0 = inlined_call_operand.hbm [shape: f32[96,128], index: 0, kind: input, shape index: {}]   ;;  %s2429_s1 = inlined_call_operand.hbm [shape: f32[4,96,128], index: 1, kind: input, shape index: {}]   ;;  %s2430_s2 = inlined_call_operand.hbm [shape: f32[4,96,128], index: 2, kind: input, shape index: {}]   ;;  %s2431_s3 = inlined_call_operand.hbm [shape: f32[4,96,128], index: 3, kind: input, shape index: {}]   ;;  %s2432_s4 = inlined_call_operand.hbm [shape: f32[96,128], index: 4, kind: output, shape index: {}]  }
   0x1   :  { %10 = vsyncpa [#allocation6], 0 }
   0x2   :  { %11 = vsyncpa [#allocation9], 0 }
   0x3   :  { %12 = vsyncpa [#allocation4], 0  ;;  %s1356_s15 = smov [#allocation5]   ;;  %s1357_s17 = smov [#allocation2]  }
   0x4   :  { %s30_s16 = sshll.u32 %s1356_s15, 4  ;;  %s18_s18 = sshll.u32 %s1357_s17, 4  ;;  %s31_s16 = int_to_ptr.vmem [resolvable:$true] %s30_s16  ;;  %s19_s18 = int_to_ptr.vmem [resolvable:$true] %s18_s18 }
   0x5   :  { %s1256_s19 = scalar_lea.vmem %s31_s16, 6144  ;;  %p1261_p1 = scmp.lt.s32.totalorder %s31_s16, %s31_s16 }
   0x6   :  { %p1257_p0 = scmp.ne.s32.totalorder %s31_s16, %s1256_s19  ;;  %p1262_p2 = scmp.lt.s32.totalorder %s1256_s19, %s1256_s19 }
   0x8   :  { %p1263_p3 = por %p1262_p2, %p1261_p1 }
   0xa   :  { %p1264_p4 = pnand %p1263_p3, %p1257_p0 }
   0xc   :  { %1267 = shalt.err (!%p1264_p4)
}
   0xd   :  { %s1358_s20 = smov 128   ;;  %s1359_s21 = smov 8  }
   0xe   :  { %36 = dma.hbm_to_vmem [thread:$0]  %s2429_s1, 6144, %s31_s16, [#allocation6], %s1358_s20, %s1358_s20, %s1359_s21  }
   0xf   :  { %s1276_s24 = scalar_lea.vmem %s19_s18, 1536  ;;  %p1281_p6 = scmp.lt.s32.totalorder %s19_s18, %s19_s18 }
  0x10   :  { %p1277_p5 = scmp.ne.s32.totalorder %s19_s18, %s1276_s24  ;;  %p1282_p7 = scmp.lt.s32.totalorder %s1276_s24, %s1276_s24 }
  0x12   :  { %p1283_p8 = por %p1282_p7, %p1281_p6 }
  0x14   :  { %p1284_p9 = pnand %p1283_p8, %p1277_p5 }
  0x16   :  { %1287 = shalt.err (!%p1284_p9)
}
  0x17   :  { %24 = dma.hbm_to_vmem [thread:$0]  %s2428_s0, 1536, %s19_s18, [#allocation3], %s1358_s20, %s1358_s20, %s1359_s21  }
  0x18   :  { %s1360_s27 = smov [#allocation7]   ;;  %s1361_s29 = smov [#allocation8]  }
  0x19   :  { %s42_s28 = sshll.u32 %s1360_s27, 4  ;;  %s54_s30 = sshll.u32 %s1361_s29, 4  ;;  %s43_s28 = int_to_ptr.vmem [resolvable:$true] %s42_s28  ;;  %s55_s30 = int_to_ptr.vmem [resolvable:$true] %s54_s30 }
  0x1a   :  { %s1296_s1 = scalar_lea.vmem %s43_s28, 6144  ;;  %p1301_p11 = scmp.lt.s32.totalorder %s43_s28, %s43_s28 }
  0x1b   :  { %p1297_p10 = scmp.ne.s32.totalorder %s43_s28, %s1296_s1  ;;  %p1302_p12 = scmp.lt.s32.totalorder %s1296_s1, %s1296_s1 }
  0x1d   :  { %p1303_p13 = por %p1302_p12, %p1301_p11 }
  0x1f   :  { %p1304_p0 = pnand %p1303_p13, %p1297_p10 }
  0x21   :  { %1307 = shalt.err (!%p1304_p0)
}
  0x22   :  { %48 = dma.hbm_to_vmem [thread:$0]  %s2430_s2, 6144, %s43_s28, [#allocation6], %s1358_s20, %s1358_s20, %s1359_s21  }
  0x23   :  { %s1316_s0 = scalar_lea.vmem %s55_s30, 6144  ;;  %p1321_p2 = scmp.lt.s32.totalorder %s55_s30, %s55_s30 }
  0x24   :  { %p1317_p1 = scmp.ne.s32.totalorder %s55_s30, %s1316_s0  ;;  %p1322_p3 = scmp.lt.s32.totalorder %s1316_s0, %s1316_s0 }
  0x26   :  { %p1323_p4 = por %p1322_p3, %p1321_p2 }
  0x28   :  { %p1324_p5 = pnand %p1323_p4, %p1317_p1 }
  0x2a   :  { %1327 = shalt.err (!%p1324_p5)
}
  0x2b   :  { %60 = dma.hbm_to_vmem [thread:$0]  %s2431_s3, 6144, %s55_s30, [#allocation9], %s1358_s20, %s1358_s20, %s1359_s21  }
  0x2c   :  { %1348 = dma.done.wait [#allocation3], 1536  }
  0x2d   :  { %1349 = vsyncadd [#allocation3], 4294965760 }
  0x2e   :  { %1350 = dma.done.wait [#allocation6], 12288  }
  0x2f   :  { %1351 = vsyncadd [#allocation6], 4294955008 }
  0x30   :  { %1352 = dma.done.wait [#allocation9], 6144  }
  0x31   :  { %1353 = vsyncadd [#allocation9], 4294961152  ;;  %v1412_v0 = vld [vmem:[#allocation7] sm:$0xff]  ;;  %v1414_v1 = vld [vmem:[#allocation7 + $0x8] sm:$0xff]  ;;  %s1362_s2 = smov [#allocation10]  }
  0x32   :  { %v1416_v2 = vld [vmem:[#allocation7 + $0x10] sm:$0xff]  ;;  %v1418_v3 = vld [vmem:[#allocation7 + $0x18] sm:$0xff]  ;;  %v1420_v4 = vld [vmem:[#allocation7 + $0x20] sm:$0xff]  ;;  %v133_v6 = vsub.f32 0.0, %v1412_v0  ;;  %v134_v8 = vsub.f32 0.0, %v1414_v1  ;;  %s1011_s3 = sshll.u32 %s1362_s2, 4  ;;  %s1012_s3 = int_to_ptr.vmem [resolvable:$true] %s1011_s3 }
  0x33   :  { %v1422_v5 = vld [vmem:[#allocation7 + $0x28] sm:$0xff]  ;;  %v1425_v7 = vld [vmem:[#allocation7 + $0x30] sm:$0xff]  ;;  %v1428_v9 = vld [vmem:[#allocation7 + $0x38] sm:$0xff]  ;;  %v135_v10 = vsub.f32 0.0, %v1416_v2  ;;  %v136_v13 = vsub.f32 0.0, %v1418_v3  ;;  %v137_v14 = vsub.f32 0.0, %v1420_v4  ;;  %p1333_p7 = scmp.lt.s32.totalorder %s1012_s3, %s1012_s3 }
  0x34   :  { %v1431_v11 = vld [vmem:[#allocation7 + $0x40] sm:$0xff]  ;;  %v1433_v12 = vld [vmem:[#allocation7 + $0x48] sm:$0xff]  ;;  %v138_v15 = vsub.f32 0.0, %v1422_v5  ;;  %v139_v16 = vsub.f32 0.0, %v1425_v7  ;;  %v145_v17 = vmul.f32 1.442695, %v133_v6 }
  0x35   :  { %v1439_v18 = vld [vmem:[#allocation7 + $0x50] sm:$0xff]  ;;  %v140_v19 = vsub.f32 0.0, %v1428_v9  ;;  %v147_v20 = vmul.f32 1.442695, %v134_v8  ;;  %v1442_v21 = vld [vmem:[#allocation7 + $0x58] sm:$0xff]  ;;  %v141_v22 = vsub.f32 0.0, %v1431_v11 }
  0x36   :  { %v142_v23 = vsub.f32 0.0, %v1433_v12  ;;  %1032 = vpow2.f32 %v145_v17  ;;  %v149_v24 = vmul.f32 1.442695, %v135_v10  ;;  %v151_v25 = vmul.f32 1.442695, %v136_v13  ;;  %v1446_v28 = vld [vmem:[#allocation2] sm:$0xff] }
  0x37   :  { %1034 = vpow2.f32 %v147_v20  ;;  %v153_v26 = vmul.f32 1.442695, %v137_v14  ;;  %v155_v27 = vmul.f32 1.442695, %v138_v15  ;;  %2562 = vst [vmem:[#allocation15_spill] sm:$0xff] %v1446_v28  ;;  %v1448_v29 = vld [vmem:[#allocation2 + $0x8] sm:$0xff] }
  0x38   :  { %2563 = vst [vmem:[#allocation16_spill] sm:$0xff] %v1448_v29  ;;  %v143_v30 = vsub.f32 0.0, %v1439_v18  ;;  %1036 = vpow2.f32 %v149_v24  ;;  %v157_v31 = vmul.f32 1.442695, %v139_v16  ;;  %v1451_v32 = vld [vmem:[#allocation2 + $0x10] sm:$0xff]  ;;  %v1453_v33 = vld [vmem:[#allocation5] sm:$0xff] }
  0x39   :  { %2564 = vst [vmem:[#allocation17_spill] sm:$0xff] %v1451_v32  ;;  %v1455_v34 = vld [vmem:[#allocation5 + $0x8] sm:$0xff]  ;;  %v144_v35 = vsub.f32 0.0, %v1442_v21  ;;  %1038 = vpow2.f32 %v151_v25  ;;  %v159_v36 = vmul.f32 1.442695, %v140_v19  ;;  %v1458_v37 = vld [vmem:[#allocation2 + $0x18] sm:$0xff]  ;;  %v121_v48 = vsub.f32 %v1446_v28, %v1453_v33 }
  0x3a   :  { %2565 = vst [vmem:[#allocation18_spill] sm:$0xff] %v1458_v37  ;;  %v1460_v38 = vld [vmem:[#allocation5 + $0x10] sm:$0xff]  ;;  %v1462_v39 = vld [vmem:[#allocation5 + $0x18] sm:$0xff]  ;;  %1040 = vpow2.f32 %v153_v26  ;;  %v161_v40 = vmul.f32 1.442695, %v141_v22  ;;  %v1464_v41 = vld [vmem:[#allocation2 + $0x20] sm:$0xff]  ;;  %v122_v49 = vsub.f32 %v1448_v29, %v1455_v34 }
  0x3b   :  { %2566 = vst [vmem:[#allocation19_spill] sm:$0xff] %v1464_v41  ;;  %1042 = vpow2.f32 %v155_v27  ;;  %v163_v42 = vmul.f32 1.442695, %v142_v23  ;;  %v1466_v43 = vld [vmem:[#allocation2 + $0x28] sm:$0xff]  ;;  %v1468_v44 = vld [vmem:[#allocation2 + $0x30] sm:$0xff]  ;;  %v1470_v45 = vld [vmem:[#allocation5 + $0x20] sm:$0xff]  ;;  %v123_v57 = vsub.f32 %v1451_v32, %v1460_v38  ;;  %v124_v58 = vsub.f32 %v1458_v37, %v1462_v39 }
  0x3c   :  { %2567 = vst [vmem:[#allocation20_spill] sm:$0xff] %v1466_v43  ;;  %2568 = vst [vmem:[#allocation21_spill] sm:$0xff] %v1468_v44  ;;  %v1472_v46 = vld [vmem:[#allocation5 + $0x28] sm:$0xff]  ;;  %v1474_v47 = vld [vmem:[#allocation5 + $0x30] sm:$0xff]  ;;  %1044 = vpow2.f32 %v157_v31  ;;  %v165_v50 = vmul.f32 1.442695, %v143_v30  ;;  %v125_v16 = vsub.f32 %v1464_v41, %v1470_v45 }
  0x3d   :  { %v1480_v51 = vld [vmem:[#allocation2 + $0x38] sm:$0xff]  ;;  %v1482_v52 = vld [vmem:[#allocation2 + $0x40] sm:$0xff]  ;;  %v1484_v53 = vld [vmem:[#allocation2 + $0x48] sm:$0xff]  ;;  %1046 = vpow2.f32 %v159_v36  ;;  %v167_v59 = vmul.f32 1.442695, %v144_v35  ;;  %v126_v22 = vsub.f32 %v1466_v43, %v1472_v46  ;;  %v127_v23 = vsub.f32 %v1468_v44, %v1474_v47  ;;  %s1328_s9 = scalar_lea.vmem %s1012_s3, 1536 }
  0x3e   :  { %2569 = vst [vmem:[#allocation22_spill] sm:$0xff] %v1480_v51  ;;  %2570 = vst [vmem:[#allocation23_spill] sm:$0xff] %v1482_v52  ;;  %v1486_v54 = vld [vmem:[#allocation5 + $0x38] sm:$0xff]  ;;  %v1488_v55 = vld [vmem:[#allocation5 + $0x40] sm:$0xff]  ;;  %1048 = vpow2.f32 %v161_v40  ;;  %p1329_p6 = scmp.ne.s32.totalorder %s1012_s3, %s1328_s9  ;;  %p1334_p8 = scmp.lt.s32.totalorder %s1328_s9, %s1328_s9 }
  0x3f   :  { %2571 = vst [vmem:[#allocation24_spill] sm:$0xff] %v1484_v53  ;;  %v1490_v56 = vld [vmem:[#allocation5 + $0x48] sm:$0xff]  ;;  %v1496_v60 = vld [vmem:[#allocation2 + $0x50] sm:$0xff]  ;;  %v1498_v61 = vld [vmem:[#allocation2 + $0x58] sm:$0xff]  ;;  %1050 = vpow2.f32 %v163_v42  ;;  %v128_v30 = vsub.f32 %v1480_v51, %v1486_v54 }
  0x40   :  { %2572 = vst [vmem:[#allocation25_spill] sm:$0xff] %v1496_v60  ;;  %2573 = vst [vmem:[#allocation26_spill] sm:$0xff] %v1498_v61  ;;  %v1500_v62 = vld [vmem:[#allocation5 + $0x50] sm:$0xff]  ;;  %v1508_v15 = vld [vmem:[#allocation5 + $0x58] sm:$0xff]  ;;  %1052 = vpow2.f32 %v165_v50  ;;  %v2590_v41 = vsub.f32 %v1484_v53, %v1490_v56  ;;  %p1335_p9 = por %p1334_p8, %p1333_p7 }
  0x41   :  { %v1514_v20 = vld [vmem:[#allocation5 + $0x60] sm:$0xff]  ;;  %1054 = vpow2.f32 %v167_v59  ;;  %v1521_v25 = vld [vmem:[#allocation5 + $0x68] sm:$0xff]  ;;  %v1523_v26 = vld [vmem:[#allocation5 + $0x70] sm:$0xff]  ;;  %v2591_v29 = vsub.f32 %v1496_v60, %v1500_v62  ;;  %v2592_v56 = vsub.f32 %v1498_v61, %v1508_v15  ;;  %v2594_v15 = vsub.f32 -0.9189385, %v1414_v1 }
  0x42   :  { %2574 = vst [vmem:[#allocation27_spill] sm:$0xff] %v1514_v20  ;;  %2575 = vst [vmem:[#allocation28_spill] sm:$0xff] %v1521_v25  ;;  %v1525_v27 = vld [vmem:[#allocation5 + $0x78] sm:$0xff]  ;;  %v1534_v36 = vld [vmem:[#allocation5 + $0x80] sm:$0xff]  ;;  %v2599_v1 = vsub.f32 -0.9189385, %v1425_v7  ;;  %p1336_p10 = pnand %p1335_p9, %p1329_p6 }
  0x43   :  { %2576 = vst [vmem:[#allocation29_spill] sm:$0xff] %v1523_v26  ;;  %2577 = vst [vmem:[#allocation30_spill] sm:$0xff] %v1525_v27  ;;  %v1536_v38 = vld [vmem:[#allocation5 + $0x88] sm:$0xff]  ;;  %v1538_v40 = vld [vmem:[#allocation5 + $0x90] sm:$0xff]  ;;  %v1033_v42 = vpop.eup %1032 }
  0x44   :  { %2578 = vst [vmem:[#allocation31_spill] sm:$0xff] %v1534_v36  ;;  %2579 = vst [vmem:[#allocation32_spill] sm:$0xff] %v1536_v38  ;;  %v1546_v54 = vld [vmem:[#allocation5 + $0x98] sm:$0xff]  ;;  %v1548_v59 = vld [vmem:[#allocation5 + $0xa0] sm:$0xff]  ;;  %v1035_v35 = vpop.eup %1034  ;;  %v169_v24 = vmul.f32 %v1033_v42, %v121_v48 }
  0x45   :  { %2580 = vst [vmem:[#allocation33_spill] sm:$0xff] %v1538_v40  ;;  %2581 = vst [vmem:[#allocation34_spill] sm:$0xff] %v1546_v54  ;;  %v1550_v19 = vld [vmem:[#allocation5 + $0xa8] sm:$0xff]  ;;  %v1552_v17 = vld [vmem:[#allocation5 + $0xb0] sm:$0xff]  ;;  %v1037_v10 = vpop.eup %1036  ;;  %v170_v50 = vmul.f32 %v1035_v35, %v122_v49 }
  0x46   :  { %2582 = vst [vmem:[#allocation35_spill] sm:$0xff] %v1548_v59  ;;  %2583 = vst [vmem:[#allocation36_spill] sm:$0xff] %v1550_v19  ;;  %v1554_v14 = vld [vmem:[#allocation5 + $0xb8] sm:$0xff]  ;;  %v1562_v8 = vld [vmem:[#allocation7 + $0x60] sm:$0xff]  ;;  %v1039_v63 = vpop.eup %1038  ;;  %v171_v46 = vmul.f32 %v1037_v10, %v123_v57  ;;  %v193_v54 = vmul.f32 0.5, %v169_v24  ;;  %v2589_v57 = vsub.f32 %v1482_v52, %v1488_v55 }
  0x47   :  { %2584 = vst [vmem:[#allocation37_spill] sm:$0xff] %v1552_v17  ;;  %2585 = vst [vmem:[#allocation38_spill] sm:$0xff] %v1554_v14  ;;  %v1564_v6 = vld [vmem:[#allocation7 + $0x68] sm:$0xff]  ;;  %v1577_v45 = vld [vmem:[#allocation7 + $0x70] sm:$0xff]  ;;  %v1041_v31 = vpop.eup %1040  ;;  %v172_v47 = vmul.f32 %v1039_v63, %v124_v58  ;;  %v292_v13 = vsub.f32 0.0, %v1562_v8  ;;  %v194_v10 = vmul.f32 0.5, %v170_v50 }
  0x48   :  { %v1579_v33 = vld [vmem:[#allocation7 + $0x78] sm:$0xff]  ;;  %v1581_v48 = vld [vmem:[#allocation7 + $0x80] sm:$0xff]  ;;  %v1590_v34 = vld [vmem:[#allocation7 + $0x88] sm:$0xff]  ;;  %v1043_v35 = vpop.eup %1042  ;;  %v173_v42 = vmul.f32 %v1041_v31, %v125_v16  ;;  %v293_v59 = vsub.f32 0.0, %v1564_v6  ;;  %v294_v40 = vsub.f32 0.0, %v1577_v45  ;;  %v195_v14 = vmul.f32 0.5, %v171_v46 }
  0x49   :  { %v1045_v39 = vpop.eup %1044  ;;  %v174_v58 = vmul.f32 %v1043_v35, %v126_v22  ;;  %v1600_v63 = vld [vmem:[#allocation7 + $0x90] sm:$0xff]  ;;  %v1605_v16 = vld [vmem:[#allocation7 + $0x98] sm:$0xff]  ;;  %v1607_v31 = vld [vmem:[#allocation7 + $0xa0] sm:$0xff]  ;;  %v297_v38 = vsub.f32 0.0, %v1590_v34  ;;  %v196_v35 = vmul.f32 0.5, %v172_v47  ;;  %v205_v44 = vmul.f32 %v193_v54, %v169_v24 }
  0x4a   :  { %2586 = vst [vmem:[#allocation39_spill] sm:$0xff] %v1600_v63  ;;  %v1047_v17 = vpop.eup %1046  ;;  %v175_v19 = vmul.f32 %v1045_v39, %v127_v23  ;;  %2587 = vst [vmem:[#allocation40_spill] sm:$0xff] %v1605_v16  ;;  %v197_v27 = vmul.f32 0.5, %v173_v42  ;;  %v1610_v51 = vld [vmem:[#allocation7 + $0xa8] sm:$0xff]  ;;  %v298_v43 = vsub.f32 0.0, %v1600_v63  ;;  %v300_v32 = vsub.f32 0.0, %v1607_v31 }
  0x4b   :  { %2588 = vst [vmem:[#allocation41_spill] sm:$0xff] %v1607_v31  ;;  %v1049_v36 = vpop.eup %1048  ;;  %v176_v22 = vmul.f32 %v1047_v17, %v128_v30  ;;  %v198_v26 = vmul.f32 0.5, %v174_v58  ;;  %v299_v30 = vsub.f32 0.0, %v1605_v16  ;;  %v1624_v24 = vld [vmem:[#allocation7 + $0xb0] sm:$0xff]  ;;  %v301_v54 = vsub.f32 0.0, %v1610_v51  ;;  %v1630_v28 = vld [vmem:[#allocation7 + $0xb8] sm:$0xff] }
  0x4c   :  { %v1051_v49 = vpop.eup %1050  ;;  %v177_v23 = vmul.f32 %v1049_v36, %v2589_v57  ;;  %v199_v39 = vmul.f32 0.5, %v175_v19  ;;  %v206_v36 = vmul.f32 %v194_v10, %v170_v50  ;;  %v207_v57 = vmul.f32 %v195_v14, %v171_v46  ;;  %v109_v14 = vld [vmem:[#allocation8] sm:$0xff] }
  0x4d   :  { %v1053_v25 = vpop.eup %1052  ;;  %v178_v37 = vmul.f32 %v1051_v49, %v2590_v41  ;;  %v200_v17 = vmul.f32 0.5, %v176_v22  ;;  %v208_v49 = vmul.f32 %v196_v35, %v172_v47  ;;  %v209_v53 = vmul.f32 %v197_v27, %v173_v42 }
  0x4e   :  { %v1055_v20 = vpop.eup %1054  ;;  %v179_v55 = vmul.f32 %v1053_v25, %v2591_v29  ;;  %v210_v52 = vmul.f32 %v198_v26, %v174_v58  ;;  %v201_v31 = vmul.f32 0.5, %v177_v23  ;;  %v211_v63 = vmul.f32 %v199_v39, %v175_v19 }
  0x4f   :  { %v180_v41 = vmul.f32 %v1055_v20, %v2592_v56  ;;  %v202_v16 = vmul.f32 0.5, %v178_v37  ;;  %v2593_v29 = vsub.f32 -0.9189385, %v1412_v0  ;;  %v212_v46 = vmul.f32 %v200_v17, %v176_v22 }
  0x50   :  { %v203_v25 = vmul.f32 0.5, %v179_v55  ;;  %v302_v50 = vsub.f32 0.0, %v1624_v24  ;;  %v304_v10 = vmul.f32 1.442695, %v292_v13  ;;  %v218_v20 = vsub.f32 %v2594_v15, %v206_v36  ;;  %v110_v13 = vld [vmem:[#allocation8 + $0x8] sm:$0xff] }
  0x51   :  { %v217_v62 = vsub.f32 %v2593_v29, %v205_v44  ;;  %v204_v60 = vmul.f32 0.5, %v180_v41  ;;  %v303_v26 = vsub.f32 0.0, %v1630_v28  ;;  %v306_v27 = vmul.f32 1.442695, %v293_v59  ;;  %v111_v59 = vld [vmem:[#allocation8 + $0x10] sm:$0xff]  ;;  %v118_v15 = vld [vmem:[#allocation8 + $0x48] sm:$0xff] }
  0x52   :  { %v2595_v47 = vsub.f32 -0.9189385, %v1416_v2  ;;  %v2596_v19 = vsub.f32 -0.9189385, %v1418_v3  ;;  %v2597_v44 = vsub.f32 -0.9189385, %v1420_v4  ;;  %v213_v39 = vmul.f32 %v201_v31, %v177_v23 }
  0x53   :  { %v2598_v22 = vsub.f32 -0.9189385, %v1422_v5  ;;  %v214_v17 = vmul.f32 %v202_v16, %v178_v37  ;;  %v223_v36 = vsub.f32 %v2599_v1, %v211_v63  ;;  %v1648_v56 = vadd.f32 %v217_v62, %v109_v14  ;;  %v112_v16 = vld [vmem:[#allocation8 + $0x18] sm:$0xff]  ;;  %v113_v23 = vld [vmem:[#allocation8 + $0x20] sm:$0xff] }
  0x54   :  { %v219_v42 = vsub.f32 %v2595_v47, %v207_v57  ;;  %v220_v0 = vsub.f32 %v2596_v19, %v208_v49  ;;  %v221_v58 = vsub.f32 %v2597_v44, %v209_v53  ;;  %v215_v2 = vmul.f32 %v203_v25, %v179_v55  ;;  %v114_v55 = vld [vmem:[#allocation8 + $0x28] sm:$0xff]  ;;  %v116_v62 = vld [vmem:[#allocation8 + $0x38] sm:$0xff]  ;;  %v1696_v1 = vld [vmem:[#allocation5 + $0xe0] sm:$0xff] }
  0x55   :  { %v222_v35 = vsub.f32 %v2598_v22, %v210_v52  ;;  %2600 = vst [vmem:[#allocation42_spill] sm:$0xff] %v1648_v56  ;;  %v2601_v57 = vsub.f32 -0.9189385, %v1428_v9  ;;  %1056 = vpow2.f32 %v304_v10  ;;  %v308_v49 = vmul.f32 1.442695, %v294_v40  ;;  %2621 = vst [vmem:[#allocation56_spill] sm:$0xff] %v1696_v1 }
  0x56   :  { %v216_v4 = vmul.f32 %v204_v60, %v180_v41  ;;  %1058 = vpow2.f32 %v306_v27  ;;  %v2602_v5 = vsub.f32 0.0, %v1579_v33  ;;  %v2603_v53 = vsub.f32 0.0, %v1581_v48  ;;  %v115_v41 = vld [vmem:[#allocation8 + $0x30] sm:$0xff]  ;;  %v1794_v1 = vld [vmem:[#allocation7 + $0x108] sm:$0xff] }
  0x57   :  { %v224_v3 = vsub.f32 %v2601_v57, %v212_v46  ;;  %v1656_v7 = vadd.f32 %v218_v20, %v110_v13  ;;  %1060 = vpow2.f32 %v308_v49  ;;  %v314_v63 = vmul.f32 1.442695, %v297_v38  ;;  %v119_v20 = vld [vmem:[#allocation8 + $0x50] sm:$0xff]  ;;  %v1705_v49 = vld [vmem:[#allocation5 + $0xe8] sm:$0xff] }
  0x58   :  { %v310_v52 = vmul.f32 1.442695, %v2602_v5  ;;  %v312_v37 = vmul.f32 1.442695, %v2603_v53  ;;  %v316_v31 = vmul.f32 1.442695, %v298_v43  ;;  %v1660_v40 = vadd.f32 %v219_v42, %v111_v59 }
  0x59   :  { %2604 = vst [vmem:[#allocation43_spill] sm:$0xff] %v1656_v7  ;;  %v2605_v9 = vsub.f32 -0.9189385, %v1431_v11  ;;  %v318_v60 = vmul.f32 1.442695, %v299_v30  ;;  %v117_v43 = vld [vmem:[#allocation8 + $0x40] sm:$0xff]  ;;  %v1668_v47 = vadd.f32 %v220_v0, %v112_v16  ;;  %v1670_v19 = vadd.f32 %v221_v58, %v113_v23 }
  0x5a   :  { %2606 = vst [vmem:[#allocation44_spill] sm:$0xff] %v1660_v40  ;;  %1062 = vpow2.f32 %v310_v52  ;;  %v2607_v14 = vsub.f32 -0.9189385, %v1433_v12  ;;  %v2608_v46 = vsub.f32 -0.9189385, %v1439_v18  ;;  %v120_v42 = vld [vmem:[#allocation8 + $0x58] sm:$0xff]  ;;  %v1672_v12 = vadd.f32 %v222_v35, %v114_v55 }
  0x5b   :  { %v225_v29 = vsub.f32 %v2605_v9, %v213_v39  ;;  %1064 = vpow2.f32 %v312_v37  ;;  %v320_v38 = vmul.f32 1.442695, %v300_v32  ;;  %v2609_v11 = vsub.f32 -0.9189385, %v1442_v21  ;;  %2610 = vst [vmem:[#allocation45_spill] sm:$0xff] %v1668_v47  ;;  %2611 = vst [vmem:[#allocation46_spill] sm:$0xff] %v1670_v19 }
  0x5c   :  { %v226_v25 = vsub.f32 %v2607_v14, %v214_v17  ;;  %v227_v10 = vsub.f32 %v2608_v46, %v215_v2  ;;  %1066 = vpow2.f32 %v314_v63  ;;  %v322_v30 = vmul.f32 1.442695, %v301_v54  ;;  %2612 = vst [vmem:[#allocation47_spill] sm:$0xff] %v1672_v12  ;;  %v1684_v54 = vld [vmem:[#allocation5 + $0xc0] sm:$0xff]  ;;  %v1686_v58 = vld [vmem:[#allocation5 + $0xc8] sm:$0xff]  ;;  %v1692_v17 = vld [vmem:[#allocation5 + $0xd0] sm:$0xff] }
  0x5d   :  { %v228_v27 = vsub.f32 %v2609_v11, %v216_v4  ;;  %1068 = vpow2.f32 %v316_v31  ;;  %v324_v18 = vmul.f32 1.442695, %v302_v50  ;;  %v1674_v44 = vadd.f32 %v223_v36, %v115_v41  ;;  %2619 = vst [vmem:[#allocation54_spill] sm:$0xff] %v1692_v17  ;;  %v1698_v36 = vld [vmem:[#allocation7 + $0xc0] sm:$0xff]  ;;  %v1700_v59 = vld [vmem:[#allocation7 + $0xc8] sm:$0xff]  ;;  %2622 = vst [vmem:[#allocation57_spill] sm:$0xff] %v1705_v49 }
  0x5e   :  { %v1676_v32 = vadd.f32 %v224_v3, %v116_v62  ;;  %1070 = vpow2.f32 %v318_v60  ;;  %v326_v22 = vmul.f32 1.442695, %v303_v26  ;;  %v1678_v13 = vadd.f32 %v225_v29, %v117_v43  ;;  %v1694_v26 = vld [vmem:[#allocation5 + $0xd8] sm:$0xff]  ;;  %v1707_v4 = vld [vmem:[#allocation5 + $0xf0] sm:$0xff]  ;;  %v2625_v53 = vld [vmem:[#allocation39_spill] sm:$0xff] }
  0x5f   :  { %2613 = vst [vmem:[#allocation48_spill] sm:$0xff] %v1674_v44  ;;  %v1680_v21 = vadd.f32 %v226_v25, %v118_v15  ;;  %v1682_v0 = vadd.f32 %v227_v10, %v119_v20  ;;  %1072 = vpow2.f32 %v320_v38  ;;  %v1688_v35 = vadd.f32 %v228_v27, %v120_v42  ;;  %2620 = vst [vmem:[#allocation55_spill] sm:$0xff] %v1694_v26  ;;  %v1709_v5 = vld [vmem:[#allocation5 + $0xf8] sm:$0xff]  ;;  %v2626_v16 = vld [vmem:[#allocation40_spill] sm:$0xff] }
  0x60   :  { %2614 = vst [vmem:[#allocation49_spill] sm:$0xff] %v1676_v32  ;;  %2615 = vst [vmem:[#allocation50_spill] sm:$0xff] %v1678_v13  ;;  %1074 = vpow2.f32 %v322_v30  ;;  %v2627_v31 = vld [vmem:[#allocation41_spill] sm:$0xff]  ;;  %v451_v9 = vsub.f32 0.0, %v1698_v36  ;;  %v452_v29 = vsub.f32 0.0, %v1700_v59  ;;  %v1720_v14 = vld [vmem:[#allocation5 + $0x100] sm:$0xff] }
  0x61   :  { %2616 = vst [vmem:[#allocation51_spill] sm:$0xff] %v1680_v21  ;;  %2617 = vst [vmem:[#allocation52_spill] sm:$0xff] %v1682_v0  ;;  %1076 = vpow2.f32 %v324_v18  ;;  %v2629_v25 = vld [vmem:[#allocation15_spill] sm:$0xff]  ;;  %v2630_v10 = vld [vmem:[#allocation16_spill] sm:$0xff] }
  0x62   :  { %2618 = vst [vmem:[#allocation53_spill] sm:$0xff] %v1688_v35  ;;  %2623 = vst [vmem:[#allocation58_spill] sm:$0xff] %v1707_v4  ;;  %1078 = vpow2.f32 %v326_v22  ;;  %v1057_v60 = vpop.eup %1056  ;;  %v2631_v15 = vld [vmem:[#allocation27_spill] sm:$0xff]  ;;  %v1729_v27 = vld [vmem:[#allocation5 + $0x108] sm:$0xff]  ;;  %v463_v35 = vmul.f32 1.442695, %v451_v9 }
  0x63   :  { %2624 = vst [vmem:[#allocation59_spill] sm:$0xff] %v1709_v5  ;;  %2628 = vst [vmem:[#allocation39_spill] sm:$0xff] %v1720_v14  ;;  %v1059_v43 = vpop.eup %1058  ;;  %v2632_v20 = vsub.f32 %v2629_v25, %v2631_v15  ;;  %v1731_v30 = vld [vmem:[#allocation5 + $0x110] sm:$0xff]  ;;  %v1733_v42 = vld [vmem:[#allocation5 + $0x118] sm:$0xff]  ;;  %v465_v0 = vmul.f32 1.442695, %v452_v29 }
  0x64   :  { %2633 = vst [vmem:[#allocation40_spill] sm:$0xff] %v1729_v27  ;;  %2634 = vst [vmem:[#allocation41_spill] sm:$0xff] %v1731_v30  ;;  %v2636_v18 = vld [vmem:[#allocation17_spill] sm:$0xff]  ;;  %v2637_v62 = vld [vmem:[#allocation18_spill] sm:$0xff]  ;;  %v1061_v55 = vpop.eup %1060  ;;  %1080 = vpow2.f32 %v463_v35 }
  0x65   :  { %v328_v11 = vmul.f32 %v1057_v60, %v2632_v20  ;;  %2635 = vst [vmem:[#allocation27_spill] sm:$0xff] %v1733_v42  ;;  %v2638_v46 = vld [vmem:[#allocation19_spill] sm:$0xff]  ;;  %v2639_v23 = vld [vmem:[#allocation28_spill] sm:$0xff]  ;;  %v1744_v20 = vld [vmem:[#allocation7 + $0xd0] sm:$0xff]  ;;  %1082 = vpow2.f32 %v465_v0 }
  0x66   :  { %v2640_v15 = vsub.f32 %v2630_v10, %v2639_v23  ;;  %v1746_v63 = vld [vmem:[#allocation7 + $0xd8] sm:$0xff]  ;;  %v2642_v37 = vld [vmem:[#allocation20_spill] sm:$0xff]  ;;  %v2643_v22 = vld [vmem:[#allocation21_spill] sm:$0xff] }
  0x67   :  { %2641 = vst [vmem:[#allocation28_spill] sm:$0xff] %v1746_v63  ;;  %v2644_v41 = vld [vmem:[#allocation22_spill] sm:$0xff]  ;;  %v1063_v2 = vpop.eup %1062  ;;  %v2645_v38 = vld [vmem:[#allocation29_spill] sm:$0xff]  ;;  %v1757_v23 = vld [vmem:[#allocation7 + $0xe0] sm:$0xff]  ;;  %v352_v19 = vmul.f32 0.5, %v328_v11 }
  0x68   :  { %v329_v60 = vmul.f32 %v1059_v43, %v2640_v15  ;;  %v2646_v39 = vsub.f32 %v2636_v18, %v2645_v38  ;;  %2647 = vst [vmem:[#allocation29_spill] sm:$0xff] %v1757_v23  ;;  %v2648_v43 = vld [vmem:[#allocation23_spill] sm:$0xff]  ;;  %v1065_v21 = vpop.eup %1064  ;;  %v2649_v52 = vld [vmem:[#allocation30_spill] sm:$0xff]  ;;  %v1764_v32 = vld [vmem:[#allocation7 + $0xe8] sm:$0xff] }
  0x69   :  { %v2650_v13 = vsub.f32 %v2637_v62, %v2649_v52  ;;  %2651 = vst [vmem:[#allocation30_spill] sm:$0xff] %v1764_v32  ;;  %v2652_v57 = vld [vmem:[#allocation24_spill] sm:$0xff]  ;;  %v2653_v38 = vld [vmem:[#allocation25_spill] sm:$0xff]  ;;  %v1067_v12 = vpop.eup %1066  ;;  %v2654_v9 = vld [vmem:[#allocation31_spill] sm:$0xff]  ;;  %v453_v52 = vsub.f32 0.0, %v1744_v20  ;;  %v456_v27 = vsub.f32 0.0, %v1764_v32  ;;  %v364_v26 = vmul.f32 %v352_v19, %v328_v11 }
  0x6a   :  { %v330_v50 = vmul.f32 %v1061_v55, %v2646_v39  ;;  %v2655_v29 = vsub.f32 %v2638_v46, %v2654_v9  ;;  %v2656_v47 = vld [vmem:[#allocation32_spill] sm:$0xff]  ;;  %v353_v7 = vmul.f32 0.5, %v329_v60  ;;  %v1780_v39 = vld [vmem:[#allocation7 + $0xf0] sm:$0xff]  ;;  %v455_v55 = vsub.f32 0.0, %v1757_v23  ;;  %v1786_v30 = vld [vmem:[#allocation7 + $0xf8] sm:$0xff] }
  0x6b   :  { %v331_v3 = vmul.f32 %v1063_v2, %v2650_v13  ;;  %v454_v13 = vsub.f32 0.0, %v1746_v63  ;;  %v1069_v2 = vpop.eup %1068  ;;  %v2657_v44 = vsub.f32 %v2642_v37, %v2656_v47  ;;  %v2658_v9 = vld [vmem:[#allocation33_spill] sm:$0xff]  ;;  %2660 = vst [vmem:[#allocation31_spill] sm:$0xff] %v1786_v30  ;;  %v2661_v47 = vld [vmem:[#allocation34_spill] sm:$0xff]  ;;  %v1792_v35 = vld [vmem:[#allocation7 + $0x100] sm:$0xff]  ;;  %v457_v0 = vsub.f32 0.0, %v1780_v39 }
  0x6c   :  { %v332_v15 = vmul.f32 %v1065_v21, %v2655_v29  ;;  %v1071_v56 = vpop.eup %1070  ;;  %v2659_v21 = vsub.f32 %v2643_v22, %v2658_v9  ;;  %v354_v42 = vmul.f32 0.5, %v330_v50  ;;  %2663 = vst [vmem:[#allocation32_spill] sm:$0xff] %v1794_v1  ;;  %v365_v62 = vmul.f32 %v353_v7, %v329_v60  ;;  %v2668_v32 = vld [vmem:[#allocation37_spill] sm:$0xff]  ;;  %v2670_v7 = vld [vmem:[#allocation38_spill] sm:$0xff] }
  0x6d   :  { %v333_v40 = vmul.f32 %v1067_v12, %v2657_v44  ;;  %v1073_v14 = vpop.eup %1072  ;;  %v2662_v12 = vsub.f32 %v2644_v41, %v2661_v47  ;;  %v355_v5 = vmul.f32 0.5, %v331_v3  ;;  %v2666_v47 = vld [vmem:[#allocation36_spill] sm:$0xff]  ;;  %v458_v17 = vsub.f32 0.0, %v1786_v30 }
  0x6e   :  { %v334_v29 = vmul.f32 %v1069_v2, %v2659_v21  ;;  %v356_v4 = vmul.f32 0.5, %v332_v15  ;;  %v1075_v9 = vpop.eup %1074  ;;  %v2664_v2 = vld [vmem:[#allocation35_spill] sm:$0xff]  ;;  %v2669_v23 = vsub.f32 %v2653_v38, %v2668_v32  ;;  %v459_v19 = vsub.f32 0.0, %v1792_v35 }
  0x6f   :  { %v335_v44 = vmul.f32 %v1071_v56, %v2662_v12  ;;  %v357_v49 = vmul.f32 0.5, %v333_v40  ;;  %v2665_v21 = vsub.f32 %v2648_v43, %v2664_v2  ;;  %v1077_v46 = vpop.eup %1076  ;;  %v2667_v56 = vsub.f32 %v2652_v57, %v2666_v47 }
  0x70   :  { %v358_v37 = vmul.f32 0.5, %v334_v29  ;;  %v1079_v18 = vpop.eup %1078  ;;  %v338_v63 = vmul.f32 %v1077_v46, %v2669_v23  ;;  %v366_v2 = vmul.f32 %v354_v42, %v330_v50  ;;  %v460_v11 = vsub.f32 0.0, %v1794_v1  ;;  %v268_v42 = vld [vmem:[#allocation8 + $0x60] sm:$0xff] }
  0x71   :  { %v336_v22 = vmul.f32 %v1073_v14, %v2665_v21  ;;  %v337_v12 = vmul.f32 %v1075_v9, %v2667_v56  ;;  %v359_v41 = vmul.f32 0.5, %v335_v44  ;;  %v1807_v14 = vld [vmem:[#allocation7 + $0x110] sm:$0xff]  ;;  %v367_v43 = vmul.f32 %v355_v5, %v331_v3  ;;  %v1811_v56 = vld [vmem:[#allocation7 + $0x118] sm:$0xff] }
  0x72   :  { %v368_v47 = vmul.f32 %v356_v4, %v332_v15  ;;  %v369_v9 = vmul.f32 %v357_v49, %v333_v40  ;;  %v2671_v60 = vsub.f32 %v1498_v61, %v2670_v7  ;;  %v370_v32 = vmul.f32 %v358_v37, %v334_v29  ;;  %v269_v40 = vld [vmem:[#allocation8 + $0x68] sm:$0xff] }
  0x73   :  { %v360_v21 = vmul.f32 0.5, %v336_v22  ;;  %v361_v30 = vmul.f32 0.5, %v337_v12  ;;  %v2672_v50 = vsub.f32 -0.9189385, %v1562_v8  ;;  %v371_v23 = vmul.f32 %v359_v41, %v335_v44 }
  0x74   :  { %v339_v57 = vmul.f32 %v1079_v18, %v2671_v60  ;;  %v2673_v38 = vsub.f32 -0.9189385, %v1564_v6  ;;  %v461_v3 = vsub.f32 0.0, %v1807_v14  ;;  %v467_v4 = vmul.f32 1.442695, %v453_v52 }
  0x75   :  { %v376_v46 = vsub.f32 %v2672_v50, %v364_v26  ;;  %v362_v49 = vmul.f32 0.5, %v338_v63  ;;  %v2674_v5 = vsub.f32 -0.9189385, %v1577_v45  ;;  %v462_v18 = vsub.f32 0.0, %v1811_v56 }
  0x76   :  { %v377_v1 = vsub.f32 %v2673_v38, %v365_v62  ;;  %v469_v7 = vmul.f32 1.442695, %v454_v13  ;;  %v372_v37 = vmul.f32 %v360_v21, %v336_v22  ;;  %v2675_v8 = vsub.f32 -0.9189385, %v1579_v33 }
  0x77   :  { %v378_v15 = vsub.f32 %v2674_v5, %v366_v2  ;;  %v2676_v41 = vsub.f32 -0.9189385, %v1581_v48  ;;  %v2677_v6 = vsub.f32 -0.9189385, %v1590_v34  ;;  %v363_v38 = vmul.f32 0.5, %v339_v57  ;;  %v270_v2 = vld [vmem:[#allocation8 + $0x70] sm:$0xff]  ;;  %v1081_v48 = vpop.eup %1080 }
  0x78   :  { %v379_v26 = vsub.f32 %v2675_v8, %v367_v43  ;;  %v373_v52 = vmul.f32 %v361_v30, %v337_v12  ;;  %v2678_v44 = vsub.f32 -0.9189385, %v2625_v53  ;;  %v1832_v45 = vadd.f32 %v376_v46, %v268_v42  ;;  %v271_v30 = vld [vmem:[#allocation8 + $0x78] sm:$0xff]  ;;  %v272_v46 = vld [vmem:[#allocation8 + $0x80] sm:$0xff] }
  0x79   :  { %v380_v29 = vsub.f32 %v2676_v41, %v368_v47  ;;  %v381_v62 = vsub.f32 %v2677_v6, %v369_v9  ;;  %v2680_v13 = vsub.f32 -0.9189385, %v2626_v16  ;;  %v1836_v21 = vadd.f32 %v377_v1, %v269_v40  ;;  %v1083_v9 = vpop.eup %1082  ;;  %v273_v16 = vld [vmem:[#allocation8 + $0x88] sm:$0xff] }
  0x7a   :  { %v382_v60 = vsub.f32 %v2678_v44, %v370_v32  ;;  %2679 = vst [vmem:[#allocation33_spill] sm:$0xff] %v1832_v45  ;;  %1084 = vpow2.f32 %v467_v4  ;;  %v471_v33 = vmul.f32 1.442695, %v455_v55  ;;  %v374_v43 = vmul.f32 %v362_v49, %v338_v63  ;;  %v275_v63 = vld [vmem:[#allocation8 + $0x98] sm:$0xff]  ;;  %v1874_v44 = vld [vmem:[#allocation5 + $0x130] sm:$0xff] }
  0x7b   :  { %v383_v22 = vsub.f32 %v2680_v13, %v371_v23  ;;  %2681 = vst [vmem:[#allocation34_spill] sm:$0xff] %v1836_v21  ;;  %1086 = vpow2.f32 %v469_v7  ;;  %v473_v34 = vmul.f32 1.442695, %v456_v27  ;;  %v475_v47 = vmul.f32 1.442695, %v457_v0  ;;  %v274_v23 = vld [vmem:[#allocation8 + $0x90] sm:$0xff] }
  0x7c   :  { %v2682_v53 = vsub.f32 -0.9189385, %v2627_v31  ;;  %1088 = vpow2.f32 %v471_v33  ;;  %v477_v32 = vmul.f32 1.442695, %v458_v17  ;;  %v479_v50 = vmul.f32 1.442695, %v459_v19 }
  0x7d   :  { %v375_v42 = vmul.f32 %v363_v38, %v339_v57  ;;  %v1840_v1 = vadd.f32 %v378_v15, %v270_v2  ;;  %1090 = vpow2.f32 %v473_v34  ;;  %v481_v55 = vmul.f32 1.442695, %v460_v11  ;;  %v276_v17 = vld [vmem:[#allocation8 + $0xa0] sm:$0xff]  ;;  %v277_v19 = vld [vmem:[#allocation8 + $0xa8] sm:$0xff]  ;;  %2698 = vst [vmem:[#allocation66_spill] sm:$0xff] %v1874_v44 }
  0x7e   :  { %v384_v12 = vsub.f32 %v2682_v53, %v372_v37  ;;  %v2684_v27 = vsub.f32 -0.9189385, %v1610_v51  ;;  %1092 = vpow2.f32 %v475_v47  ;;  %v483_v4 = vmul.f32 1.442695, %v461_v3  ;;  %v1878_v2 = vld [vmem:[#allocation5 + $0x140] sm:$0xff]  ;;  %v2702_v33 = vld [vmem:[#allocation28_spill] sm:$0xff] }
  0x7f   :  { %2683 = vst [vmem:[#allocation35_spill] sm:$0xff] %v1840_v1  ;;  %v2685_v31 = vsub.f32 %v2629_v25, %v1684_v54  ;;  %v1847_v49 = vadd.f32 %v379_v26, %v271_v30  ;;  %1094 = vpow2.f32 %v477_v32  ;;  %v485_v57 = vmul.f32 1.442695, %v462_v18  ;;  %v278_v54 = vld [vmem:[#allocation8 + $0xb0] sm:$0xff]  ;;  %v279_v18 = vld [vmem:[#allocation8 + $0xb8] sm:$0xff]  ;;  %2700 = vst [vmem:[#allocation68_spill] sm:$0xff] %v1878_v2 }
  0x80   :  { %v385_v0 = vsub.f32 %v2684_v27, %v373_v52  ;;  %v2687_v11 = vsub.f32 %v2630_v10, %v1686_v58  ;;  %v2688_v15 = vsub.f32 -0.9189385, %v1624_v24  ;;  %v1854_v7 = vadd.f32 %v380_v29, %v272_v46  ;;  %v1868_v29 = vld [vmem:[#allocation5 + $0x120] sm:$0xff]  ;;  %v1885_v47 = vld [vmem:[#allocation5 + $0x148] sm:$0xff]  ;;  %v2708_v30 = vld [vmem:[#allocation30_spill] sm:$0xff] }
  0x81   :  { %v487_v40 = vmul.f32 %v1081_v48, %v2685_v31  ;;  %2686 = vst [vmem:[#allocation36_spill] sm:$0xff] %v1847_v49  ;;  %v1856_v3 = vadd.f32 %v381_v62, %v273_v16  ;;  %1096 = vpow2.f32 %v479_v50  ;;  %v2691_v37 = vsub.f32 -0.9189385, %v1630_v28  ;;  %2696 = vst [vmem:[#allocation64_spill] sm:$0xff] %v1868_v29  ;;  %v1870_v62 = vld [vmem:[#allocation5 + $0x128] sm:$0xff]  ;;  %v2709_v32 = vld [vmem:[#allocation31_spill] sm:$0xff] }
  0x82   :  { %v488_v5 = vmul.f32 %v1083_v9, %v2687_v11  ;;  %v386_v51 = vsub.f32 %v2688_v15, %v374_v43  ;;  %2689 = vst [vmem:[#allocation37_spill] sm:$0xff] %v1854_v7  ;;  %v1860_v26 = vadd.f32 %v382_v60, %v274_v23  ;;  %v1862_v41 = vadd.f32 %v383_v22, %v275_v63  ;;  %v1876_v60 = vld [vmem:[#allocation5 + $0x138] sm:$0xff]  ;;  %v2703_v43 = vld [vmem:[#allocation29_spill] sm:$0xff]  ;;  %v2710_v16 = vld [vmem:[#allocation32_spill] sm:$0xff] }
  0x83   :  { %2690 = vst [vmem:[#allocation38_spill] sm:$0xff] %v1856_v3  ;;  %v387_v8 = vsub.f32 %v2691_v37, %v375_v42  ;;  %1098 = vpow2.f32 %v481_v55  ;;  %v1864_v58 = vadd.f32 %v384_v12, %v276_v17  ;;  %v1866_v6 = vadd.f32 %v385_v0, %v277_v19  ;;  %2697 = vst [vmem:[#allocation65_spill] sm:$0xff] %v1870_v62  ;;  %v1902_v31 = vld [vmem:[#allocation5 + $0x168] sm:$0xff]  ;;  %v2713_v11 = vld [vmem:[#allocation17_spill] sm:$0xff] }
  0x84   :  { %2692 = vst [vmem:[#allocation60_spill] sm:$0xff] %v1860_v26  ;;  %2693 = vst [vmem:[#allocation61_spill] sm:$0xff] %v1862_v41  ;;  %1100 = vpow2.f32 %v483_v4  ;;  %v511_v24 = vmul.f32 0.5, %v487_v40  ;;  %v499_v28 = vsub.f32 -0.9189385, %v1698_v36  ;;  %v512_v52 = vmul.f32 0.5, %v488_v5 }
  0x85   :  { %2694 = vst [vmem:[#allocation62_spill] sm:$0xff] %v1864_v58  ;;  %2695 = vst [vmem:[#allocation63_spill] sm:$0xff] %v1866_v6  ;;  %1102 = vpow2.f32 %v485_v57  ;;  %v500_v38 = vsub.f32 -0.9189385, %v1700_v59  ;;  %v1880_v13 = vadd.f32 %v386_v51, %v278_v54  ;;  %v1887_v36 = vld [vmem:[#allocation5 + $0x150] sm:$0xff]  ;;  %v1889_v59 = vld [vmem:[#allocation5 + $0x158] sm:$0xff]  ;;  %v1891_v9 = vadd.f32 %v387_v8, %v279_v18 }
  0x86   :  { %2699 = vst [vmem:[#allocation67_spill] sm:$0xff] %v1876_v60  ;;  %2704 = vst [vmem:[#allocation28_spill] sm:$0xff] %v1885_v47  ;;  %v523_v23 = vmul.f32 %v511_v24, %v487_v40  ;;  %v524_v0 = vmul.f32 %v512_v52, %v488_v5  ;;  %v1900_v4 = vld [vmem:[#allocation5 + $0x160] sm:$0xff]  ;;  %v2714_v15 = vld [vmem:[#allocation54_spill] sm:$0xff]  ;;  %v2750_v26 = vsub.f32 -0.9189385, %v2703_v43 }
  0x87   :  { %2701 = vst [vmem:[#allocation69_spill] sm:$0xff] %v1880_v13  ;;  %2705 = vst [vmem:[#allocation29_spill] sm:$0xff] %v1887_v36  ;;  %v1085_v63 = vpop.eup %1084  ;;  %v2715_v51 = vsub.f32 %v2713_v11, %v2714_v15  ;;  %v1911_v40 = vld [vmem:[#allocation5 + $0x170] sm:$0xff]  ;;  %v1913_v37 = vld [vmem:[#allocation5 + $0x178] sm:$0xff]  ;;  %v2751_v7 = vsub.f32 -0.9189385, %v2708_v30 }
  0x88   :  { %2706 = vst [vmem:[#allocation70_spill] sm:$0xff] %v1889_v59  ;;  %2707 = vst [vmem:[#allocation71_spill] sm:$0xff] %v1891_v9  ;;  %v1087_v57 = vpop.eup %1086  ;;  %v2718_v8 = vld [vmem:[#allocation18_spill] sm:$0xff]  ;;  %v2719_v24 = vld [vmem:[#allocation19_spill] sm:$0xff]  ;;  %v535_v34 = vsub.f32 %v499_v28, %v523_v23  ;;  %v536_v59 = vsub.f32 %v500_v38, %v524_v0 }
  0x89   :  { %2711 = vst [vmem:[#allocation30_spill] sm:$0xff] %v1900_v4  ;;  %2712 = vst [vmem:[#allocation31_spill] sm:$0xff] %v1902_v31  ;;  %v489_v54 = vmul.f32 %v1085_v63, %v2715_v51  ;;  %v1089_v17 = vpop.eup %1088  ;;  %v2720_v19 = vld [vmem:[#allocation55_spill] sm:$0xff]  ;;  %v2722_v63 = vld [vmem:[#allocation20_spill] sm:$0xff] }
  0x8a   :  { %2716 = vst [vmem:[#allocation32_spill] sm:$0xff] %v1911_v40  ;;  %2717 = vst [vmem:[#allocation54_spill] sm:$0xff] %v1913_v37  ;;  %v2721_v27 = vsub.f32 %v2718_v8, %v2720_v19  ;;  %v1924_v15 = vld [vmem:[#allocation7 + $0x120] sm:$0xff]  ;;  %v2723_v42 = vld [vmem:[#allocation21_spill] sm:$0xff]  ;;  %v1091_v18 = vpop.eup %1090 }
  0x8b   :  { %v2724_v5 = vld [vmem:[#allocation22_spill] sm:$0xff]  ;;  %v2725_v12 = vld [vmem:[#allocation56_spill] sm:$0xff]  ;;  %v1093_v22 = vpop.eup %1092  ;;  %v427_v47 = vld [vmem:[#allocation8 + $0xc0] sm:$0xff]  ;;  %v610_v0 = vsub.f32 0.0, %v1924_v15 }
  0x8c   :  { %v490_v55 = vmul.f32 %v1087_v57, %v2721_v27  ;;  %v2726_v52 = vsub.f32 %v2719_v24, %v2725_v12  ;;  %v1935_v48 = vld [vmem:[#allocation7 + $0x128] sm:$0xff]  ;;  %v2727_v27 = vld [vmem:[#allocation23_spill] sm:$0xff]  ;;  %v2729_v46 = vld [vmem:[#allocation57_spill] sm:$0xff]  ;;  %v513_v24 = vmul.f32 0.5, %v489_v54 }
  0x8d   :  { %v2728_v57 = vld [vmem:[#allocation24_spill] sm:$0xff]  ;;  %v2730_v36 = vsub.f32 %v2722_v63, %v2729_v46  ;;  %v1944_v2 = vld [vmem:[#allocation7 + $0x130] sm:$0xff]  ;;  %v1946_v12 = vld [vmem:[#allocation7 + $0x138] sm:$0xff]  ;;  %v611_v60 = vsub.f32 0.0, %v1935_v48 }
  0x8e   :  { %v491_v53 = vmul.f32 %v1089_v17, %v2726_v52  ;;  %v2731_v28 = vld [vmem:[#allocation25_spill] sm:$0xff]  ;;  %v1095_v52 = vpop.eup %1094  ;;  %v428_v19 = vld [vmem:[#allocation8 + $0xc8] sm:$0xff]  ;;  %v2732_v51 = vld [vmem:[#allocation58_spill] sm:$0xff]  ;;  %v514_v46 = vmul.f32 0.5, %v490_v55  ;;  %v612_v44 = vsub.f32 0.0, %v1944_v2  ;;  %v613_v11 = vsub.f32 0.0, %v1946_v12 }
  0x8f   :  { %v492_v50 = vmul.f32 %v1091_v18, %v2730_v36  ;;  %v2733_v31 = vsub.f32 %v2723_v42, %v2732_v51  ;;  %v1955_v36 = vld [vmem:[#allocation7 + $0x140] sm:$0xff]  ;;  %v1957_v38 = vld [vmem:[#allocation7 + $0x148] sm:$0xff]  ;;  %v1097_v18 = vpop.eup %1096  ;;  %v1967_v42 = vadd.f32 %v535_v34, %v427_v47  ;;  %v1978_v10 = vld [vmem:[#allocation7 + $0x158] sm:$0xff]  ;;  %v525_v13 = vmul.f32 %v513_v24, %v489_v54 }
  0x90   :  { %v2734_v23 = vld [vmem:[#allocation59_spill] sm:$0xff]  ;;  %v515_v17 = vmul.f32 0.5, %v491_v53  ;;  %v1099_v8 = vpop.eup %1098  ;;  %v2739_v62 = vld [vmem:[#allocation40_spill] sm:$0xff]  ;;  %v615_v34 = vsub.f32 0.0, %v1957_v38  ;;  %v526_v6 = vmul.f32 %v514_v46, %v490_v55  ;;  %v1992_v29 = vld [vmem:[#allocation7 + $0x170] sm:$0xff]  ;;  %v617_v55 = vsub.f32 0.0, %v1978_v10 }
  0x91   :  { %v493_v4 = vmul.f32 %v1093_v22, %v2733_v31  ;;  %v2735_v40 = vsub.f32 %v2724_v5, %v2734_v23  ;;  %v516_v37 = vmul.f32 0.5, %v492_v50  ;;  %v2736_v22 = vld [vmem:[#allocation39_spill] sm:$0xff]  ;;  %2738 = vst [vmem:[#allocation55_spill] sm:$0xff] %v1967_v42  ;;  %v1101_v9 = vpop.eup %1100  ;;  %v2740_v23 = vsub.f32 %v2728_v57, %v2739_v62  ;;  %v1976_v5 = vld [vmem:[#allocation7 + $0x150] sm:$0xff]  ;;  %2746 = vst [vmem:[#allocation57_spill] sm:$0xff] %v1992_v29 }
  0x92   :  { %v2737_v31 = vsub.f32 %v2727_v27, %v2736_v22  ;;  %v614_v22 = vsub.f32 0.0, %v1955_v36  ;;  %v1103_v47 = vpop.eup %1102  ;;  %v1985_v62 = vld [vmem:[#allocation7 + $0x160] sm:$0xff]  ;;  %v1994_v25 = vld [vmem:[#allocation7 + $0x178] sm:$0xff]  ;;  %v616_v54 = vsub.f32 0.0, %v1976_v5  ;;  %v626_v21 = vmul.f32 1.442695, %v612_v44 }
  0x93   :  { %v494_v63 = vmul.f32 %v1095_v52, %v2735_v40  ;;  %v496_v40 = vmul.f32 %v1099_v8, %v2740_v23  ;;  %v1974_v52 = vadd.f32 %v536_v59, %v428_v19  ;;  %v517_v42 = vmul.f32 0.5, %v493_v4  ;;  %v1987_v59 = vld [vmem:[#allocation7 + $0x168] sm:$0xff]  ;;  %v2744_v8 = vld [vmem:[#allocation27_spill] sm:$0xff]  ;;  %2747 = vst [vmem:[#allocation58_spill] sm:$0xff] %v1994_v25  ;;  %v430_v1 = vld [vmem:[#allocation8 + $0xd8] sm:$0xff] }
  0x94   :  { %v495_v51 = vmul.f32 %v1097_v18, %v2737_v31  ;;  %v2742_v18 = vld [vmem:[#allocation41_spill] sm:$0xff]  ;;  %v2745_v19 = vsub.f32 %v1498_v61, %v2744_v8  ;;  %v528_v58 = vmul.f32 %v516_v37, %v492_v50  ;;  %v619_v8 = vsub.f32 0.0, %v1987_v59  ;;  %v432_v43 = vld [vmem:[#allocation8 + $0xe8] sm:$0xff] }
  0x95   :  { %2741 = vst [vmem:[#allocation56_spill] sm:$0xff] %v1974_v52  ;;  %v2743_v31 = vsub.f32 %v2731_v28, %v2742_v18  ;;  %v518_v57 = vmul.f32 0.5, %v494_v63  ;;  %v527_v52 = vmul.f32 %v515_v17, %v491_v53  ;;  %v2748_v53 = vsub.f32 -0.9189385, %v1744_v20 }
  0x96   :  { %v498_v23 = vmul.f32 %v1103_v47, %v2745_v19  ;;  %v519_v18 = vmul.f32 0.5, %v495_v51  ;;  %v529_v47 = vmul.f32 %v517_v42, %v493_v4  ;;  %v620_v37 = vsub.f32 0.0, %v1992_v29  ;;  %v429_v19 = vld [vmem:[#allocation8 + $0xd0] sm:$0xff] }
  0x97   :  { %v497_v27 = vmul.f32 %v1101_v9, %v2743_v31  ;;  %v520_v9 = vmul.f32 0.5, %v496_v40  ;;  %v618_v31 = vsub.f32 0.0, %v1985_v62  ;;  %v537_v50 = vsub.f32 %v2748_v53, %v525_v13 }
  0x98   :  { %v522_v46 = vmul.f32 0.5, %v498_v23  ;;  %v621_v17 = vsub.f32 0.0, %v1994_v25  ;;  %v530_v61 = vmul.f32 %v518_v57, %v494_v63  ;;  %v2749_v28 = vsub.f32 -0.9189385, %v2702_v33 }
  0x99   :  { %v521_v24 = vmul.f32 0.5, %v497_v27  ;;  %v539_v3 = vsub.f32 %v2750_v26, %v527_v52  ;;  %v540_v49 = vsub.f32 %v2751_v7, %v528_v58  ;;  %v531_v42 = vmul.f32 %v519_v18, %v495_v51  ;;  %v431_v26 = vld [vmem:[#allocation8 + $0xe0] sm:$0xff]  ;;  %v436_v52 = vld [vmem:[#allocation8 + $0x108] sm:$0xff] }
  0x9a   :  { %v538_v41 = vsub.f32 %v2749_v28, %v526_v6  ;;  %v532_v4 = vmul.f32 %v520_v9, %v496_v40  ;;  %v622_v20 = vmul.f32 1.442695, %v610_v0  ;;  %v624_v13 = vmul.f32 1.442695, %v611_v60  ;;  %v434_v28 = vld [vmem:[#allocation8 + $0xf8] sm:$0xff]  ;;  %v435_v40 = vld [vmem:[#allocation8 + $0x100] sm:$0xff] }
  0x9b   :  { %v533_v53 = vmul.f32 %v521_v24, %v497_v27  ;;  %v534_v29 = vmul.f32 %v522_v46, %v498_v23  ;;  %v628_v25 = vmul.f32 1.442695, %v613_v11  ;;  %v2752_v63 = vsub.f32 -0.9189385, %v1780_v39  ;;  %v433_v27 = vld [vmem:[#allocation8 + $0xf0] sm:$0xff]  ;;  %v438_v23 = vld [vmem:[#allocation8 + $0x118] sm:$0xff] }
  0x9c   :  { %v2012_v33 = vadd.f32 %v537_v50, %v429_v19  ;;  %1104 = vpow2.f32 %v622_v20  ;;  %v630_v6 = vmul.f32 1.442695, %v614_v22  ;;  %v2754_v7 = vsub.f32 -0.9189385, %v2709_v32  ;;  %v2789_v50 = vld [vmem:[#allocation52_spill] sm:$0xff]  ;;  %v2791_v46 = vld [vmem:[#allocation65_spill] sm:$0xff] }
  0x9d   :  { %v541_v57 = vsub.f32 %v2752_v63, %v529_v47  ;;  %v2016_v30 = vadd.f32 %v538_v41, %v430_v1  ;;  %1106 = vpow2.f32 %v624_v13  ;;  %v632_v60 = vmul.f32 1.442695, %v615_v34  ;;  %v437_v34 = vld [vmem:[#allocation8 + $0x110] sm:$0xff]  ;;  %v2768_v63 = vld [vmem:[#allocation58_spill] sm:$0xff] }
  0x9e   :  { %2753 = vst [vmem:[#allocation59_spill] sm:$0xff] %v2012_v33  ;;  %v542_v58 = vsub.f32 %v2754_v7, %v530_v61  ;;  %v2756_v44 = vsub.f32 -0.9189385, %v1792_v35  ;;  %v2757_v39 = vsub.f32 -0.9189385, %v2710_v16  ;;  %1108 = vpow2.f32 %v626_v21  ;;  %v2767_v13 = vld [vmem:[#allocation57_spill] sm:$0xff] }
  0x9f   :  { %2755 = vst [vmem:[#allocation39_spill] sm:$0xff] %v2016_v30  ;;  %v634_v51 = vmul.f32 1.442695, %v616_v54  ;;  %v2758_v22 = vsub.f32 -0.9189385, %v1807_v14  ;;  %1110 = vpow2.f32 %v628_v25  ;;  %v2026_v18 = vadd.f32 %v539_v3, %v431_v26  ;;  %v2770_v26 = vld [vmem:[#allocation44_spill] sm:$0xff] }
  0xa0   :  { %v543_v11 = vsub.f32 %v2756_v44, %v531_v42  ;;  %v544_v0 = vsub.f32 %v2757_v39, %v532_v4  ;;  %v2759_v61 = vsub.f32 -0.9189385, %v1811_v56  ;;  %v636_v41 = vmul.f32 1.442695, %v617_v55  ;;  %v2765_v42 = vld [vmem:[#allocation34_spill] sm:$0xff]  ;;  %v2766_v4 = vld [vmem:[#allocation43_spill] sm:$0xff] }
  0xa1   :  { %v545_v32 = vsub.f32 %v2758_v22, %v533_v53  ;;  %2760 = vst [vmem:[#allocation40_spill] sm:$0xff] %v2026_v18  ;;  %v2028_v35 = vadd.f32 %v540_v49, %v432_v43  ;;  %1112 = vpow2.f32 %v630_v6  ;;  %v638_v16 = vmul.f32 1.442695, %v618_v31  ;;  %v2769_v6 = vld [vmem:[#allocation35_spill] sm:$0xff]  ;;  %v2771_v7 = vld [vmem:[#allocation36_spill] sm:$0xff]  ;;  %v2774_v44 = vld [vmem:[#allocation46_spill] sm:$0xff] }
  0xa2   :  { %v546_v1 = vsub.f32 %v2759_v61, %v534_v29  ;;  %v2030_v21 = vadd.f32 %v541_v57, %v433_v27  ;;  %v2032_v9 = vadd.f32 %v542_v58, %v434_v28  ;;  %1114 = vpow2.f32 %v632_v60  ;;  %v2772_v58 = vld [vmem:[#allocation45_spill] sm:$0xff]  ;;  %v2775_v39 = vld [vmem:[#allocation38_spill] sm:$0xff]  ;;  %v2786_v53 = vld [vmem:[#allocation63_spill] sm:$0xff] }
  0xa3   :  { %2761 = vst [vmem:[#allocation41_spill] sm:$0xff] %v2028_v35  ;;  %v640_v14 = vmul.f32 1.442695, %v619_v8  ;;  %v2034_v54 = vadd.f32 %v543_v11, %v435_v40  ;;  %v2036_v56 = vadd.f32 %v544_v0, %v436_v52  ;;  %1116 = vpow2.f32 %v634_v51  ;;  %v2773_v28 = vld [vmem:[#allocation37_spill] sm:$0xff]  ;;  %v2776_v0 = vld [vmem:[#allocation47_spill] sm:$0xff]  ;;  %v2777_v40 = vld [vmem:[#allocation60_spill] sm:$0xff] }
  0xa4   :  { %2762 = vst [vmem:[#allocation27_spill] sm:$0xff] %v2030_v21  ;;  %2763 = vst [vmem:[#allocation72_spill] sm:$0xff] %v2032_v9  ;;  %v642_v25 = vmul.f32 1.442695, %v620_v37  ;;  %v2038_v29 = vadd.f32 %v545_v32, %v437_v34  ;;  %v2040_v3 = vadd.f32 %v546_v1, %v438_v23  ;;  %1118 = vpow2.f32 %v636_v41  ;;  %v2778_v52 = vld [vmem:[#allocation48_spill] sm:$0xff]  ;;  %v2779_v32 = vld [vmem:[#allocation61_spill] sm:$0xff] }
  0xa5   :  { %v644_v49 = vmul.f32 1.442695, %v621_v17  ;;  %1120 = vpow2.f32 %v638_v16  ;;  %v658_v55 = vsub.f32 -0.9189385, %v1924_v15  ;;  %v659_v24 = vsub.f32 -0.9189385, %v1935_v48 }
  0xa6   :  { %1122 = vpow2.f32 %v640_v14  ;;  %v2764_v48 = vld [vmem:[#allocation42_spill] sm:$0xff]  ;;  %v719_v20 = vmax.f32 %v2766_v4, %v2765_v42  ;;  %v720_v43 = vmax.f32 %v2770_v26, %v2769_v6  ;;  %v721_v60 = vmax.f32 %v2772_v58, %v2771_v7  ;;  %v2780_v61 = vld [vmem:[#allocation49_spill] sm:$0xff]  ;;  %v2781_v34 = vld [vmem:[#allocation15_spill] sm:$0xff] }
  0xa7   :  { %1124 = vpow2.f32 %v642_v25  ;;  %v718_v19 = vmax.f32 %v2764_v48, %v1832_v45  ;;  %v722_v11 = vmax.f32 %v2774_v44, %v2773_v28  ;;  %v723_v51 = vmax.f32 %v2776_v0, %v2775_v39  ;;  %v2782_v23 = vld [vmem:[#allocation64_spill] sm:$0xff]  ;;  %v2784_v25 = vld [vmem:[#allocation62_spill] sm:$0xff]  ;;  %v2787_v15 = vld [vmem:[#allocation51_spill] sm:$0xff] }
  0xa8   :  { %1126 = vpow2.f32 %v644_v49  ;;  %v724_v22 = vmax.f32 %v2778_v52, %v2777_v40  ;;  %v725_v1 = vmax.f32 %v2780_v61, %v2779_v32  ;;  %v2783_v16 = vsub.f32 %v2781_v34, %v2782_v23  ;;  %v2785_v49 = vld [vmem:[#allocation50_spill] sm:$0xff]  ;;  %v2788_v37 = vld [vmem:[#allocation69_spill] sm:$0xff]  ;;  %v2790_v31 = vld [vmem:[#allocation16_spill] sm:$0xff] }
  0xa9   :  { %v1105_v27 = vpop.eup %1104  ;;  %v2792_v40 = vsub.f32 %v2790_v31, %v2791_v46  ;;  %v2793_v32 = vld [vmem:[#allocation71_spill] sm:$0xff]  ;;  %v2794_v28 = vld [vmem:[#allocation53_spill] sm:$0xff]  ;;  %v2798_v17 = vld [vmem:[#allocation66_spill] sm:$0xff]  ;;  %v2094_v61 = vmax.f32 %v720_v43, %v2012_v33  ;;  %v2097_v46 = vmax.f32 %v721_v60, %v2016_v30 }
  0xaa   :  { %v1107_v41 = vpop.eup %1106  ;;  %v646_v14 = vmul.f32 %v1105_v27, %v2783_v16  ;;  %v2795_v6 = vld [vmem:[#allocation55_spill] sm:$0xff]  ;;  %v2796_v27 = vld [vmem:[#allocation56_spill] sm:$0xff]  ;;  %v2797_v57 = vld [vmem:[#allocation17_spill] sm:$0xff]  ;;  %v2112_v30 = vmax.f32 %v724_v22, %v2030_v21 }
  0xab   :  { %v1109_v8 = vpop.eup %1108  ;;  %v647_v39 = vmul.f32 %v1107_v41, %v2792_v40  ;;  %v2085_v34 = vmax.f32 %v718_v19, %v2795_v6  ;;  %v2088_v23 = vmax.f32 %v719_v20, %v2796_v27  ;;  %v2799_v42 = vsub.f32 %v2797_v57, %v2798_v17  ;;  %v2800_v40 = vld [vmem:[#allocation18_spill] sm:$0xff]  ;;  %v2801_v41 = vld [vmem:[#allocation67_spill] sm:$0xff]  ;;  %v2810_v0 = vld [vmem:[#allocation21_spill] sm:$0xff] }
  0xac   :  { %v1111_v16 = vpop.eup %1110  ;;  %v670_v47 = vmul.f32 0.5, %v646_v14  ;;  %v2802_v19 = vsub.f32 %v2800_v40, %v2801_v41  ;;  %v2103_v20 = vmax.f32 %v722_v11, %v2026_v18  ;;  %v2106_v27 = vmax.f32 %v723_v51, %v2028_v35  ;;  %v2803_v17 = vld [vmem:[#allocation19_spill] sm:$0xff]  ;;  %v2806_v40 = vld [vmem:[#allocation20_spill] sm:$0xff]  ;;  %v2811_v44 = vld [vmem:[#allocation29_spill] sm:$0xff] }
  0xad   :  { %v648_v45 = vmul.f32 %v1109_v8, %v2799_v42  ;;  %v671_v6 = vmul.f32 0.5, %v647_v39  ;;  %v2804_v42 = vld [vmem:[#allocation68_spill] sm:$0xff]  ;;  %v2118_v51 = vmax.f32 %v725_v1, %v2032_v9  ;;  %v2814_v21 = vld [vmem:[#allocation70_spill] sm:$0xff] }
  0xae   :  { %v1113_v31 = vpop.eup %1112  ;;  %v649_v7 = vmul.f32 %v1111_v16, %v2802_v19  ;;  %v2805_v57 = vsub.f32 %v2803_v17, %v2804_v42  ;;  %v682_v60 = vmul.f32 %v670_v47, %v646_v14  ;;  %v2807_v16 = vld [vmem:[#allocation28_spill] sm:$0xff]  ;;  %v2812_v17 = vsub.f32 %v2810_v0, %v2811_v44  ;;  %v2817_v1 = vld [vmem:[#allocation30_spill] sm:$0xff] }
  0xaf   :  { %v1115_v8 = vpop.eup %1114  ;;  %v672_v33 = vmul.f32 0.5, %v648_v45  ;;  %v2808_v41 = vsub.f32 %v2806_v40, %v2807_v16  ;;  %v683_v18 = vmul.f32 %v671_v6, %v647_v39  ;;  %2809 = vst [vmem:[#allocation42_spill] sm:$0xff] %v2118_v51  ;;  %v2816_v39 = vld [vmem:[#allocation23_spill] sm:$0xff]  ;;  %v2819_v44 = vsub.f32 -0.9189385, %v1944_v2 }
  0xb0   :  { %v650_v43 = vmul.f32 %v1113_v31, %v2805_v57  ;;  %v1117_v52 = vpop.eup %1116  ;;  %v673_v11 = vmul.f32 0.5, %v649_v7  ;;  %v694_v14 = vsub.f32 %v658_v55, %v682_v60  ;;  %v2813_v57 = vld [vmem:[#allocation22_spill] sm:$0xff]  ;;  %v2820_v55 = vld [vmem:[#allocation24_spill] sm:$0xff] }
  0xb1   :  { %v651_v19 = vmul.f32 %v1115_v8, %v2808_v41  ;;  %v1119_v35 = vpop.eup %1118  ;;  %v652_v31 = vmul.f32 %v1117_v52, %v2812_v17  ;;  %v684_v47 = vmul.f32 %v672_v33, %v648_v45  ;;  %v2815_v58 = vsub.f32 %v2813_v57, %v2814_v21  ;;  %v586_v33 = vld [vmem:[#allocation8 + $0x120] sm:$0xff]  ;;  %v2824_v17 = vld [vmem:[#allocation25_spill] sm:$0xff] }
  0xb2   :  { %v674_v42 = vmul.f32 0.5, %v650_v43  ;;  %v1121_v22 = vpop.eup %1120  ;;  %v685_v8 = vmul.f32 %v673_v11, %v649_v7  ;;  %v695_v16 = vsub.f32 %v659_v24, %v683_v18  ;;  %v2818_v41 = vsub.f32 %v2816_v39, %v2817_v1  ;;  %v2821_v52 = vld [vmem:[#allocation31_spill] sm:$0xff]  ;;  %v587_v11 = vld [vmem:[#allocation8 + $0x128] sm:$0xff]  ;;  %v588_v1 = vld [vmem:[#allocation8 + $0x130] sm:$0xff] }
  0xb3   :  { %v653_v26 = vmul.f32 %v1119_v35, %v2815_v58  ;;  %v675_v40 = vmul.f32 0.5, %v651_v19  ;;  %v1123_v6 = vpop.eup %1122  ;;  %v676_v4 = vmul.f32 0.5, %v652_v31  ;;  %v696_v0 = vsub.f32 %v2819_v44, %v684_v47  ;;  %v2828_v44 = vld [vmem:[#allocation26_spill] sm:$0xff] }
  0xb4   :  { %v654_v9 = vmul.f32 %v1121_v22, %v2818_v41  ;;  %v686_v51 = vmul.f32 %v674_v42, %v650_v43  ;;  %v1125_v45 = vpop.eup %1124  ;;  %v2822_v60 = vsub.f32 %v2820_v55, %v2821_v52  ;;  %v2823_v18 = vsub.f32 -0.9189385, %v1946_v12  ;;  %v2825_v22 = vld [vmem:[#allocation32_spill] sm:$0xff]  ;;  %v589_v41 = vld [vmem:[#allocation8 + $0x138] sm:$0xff] }
  0xb5   :  { %v677_v35 = vmul.f32 0.5, %v653_v26  ;;  %v687_v58 = vmul.f32 %v675_v40, %v651_v19  ;;  %v1127_v7 = vpop.eup %1126  ;;  %v2826_v57 = vsub.f32 %v2824_v17, %v2825_v22  ;;  %v688_v2 = vmul.f32 %v676_v4, %v652_v31 }
  0xb6   :  { %v655_v21 = vmul.f32 %v1123_v6, %v2822_v60  ;;  %v697_v24 = vsub.f32 %v2823_v18, %v685_v8  ;;  %v678_v42 = vmul.f32 0.5, %v654_v9  ;;  %v2827_v47 = vsub.f32 -0.9189385, %v1955_v36  ;;  %v2829_v6 = vld [vmem:[#allocation54_spill] sm:$0xff]  ;;  %v590_v60 = vld [vmem:[#allocation8 + $0x140] sm:$0xff]  ;;  %v591_v18 = vld [vmem:[#allocation8 + $0x148] sm:$0xff] }
  0xb7   :  { %v656_v43 = vmul.f32 %v1125_v45, %v2826_v57  ;;  %v2830_v55 = vsub.f32 %v2828_v44, %v2829_v6  ;;  %v689_v12 = vmul.f32 %v677_v35, %v653_v26  ;;  %v2831_v8 = vsub.f32 -0.9189385, %v1957_v38  ;;  %v593_v26 = vld [vmem:[#allocation8 + $0x158] sm:$0xff] }
  0xb8   :  { %v698_v39 = vsub.f32 %v2827_v47, %v686_v51  ;;  %v679_v40 = vmul.f32 0.5, %v655_v21  ;;  %v690_v45 = vmul.f32 %v678_v42, %v654_v9  ;;  %v2832_v4 = vsub.f32 -0.9189385, %v1976_v5  ;;  %v592_v51 = vld [vmem:[#allocation8 + $0x150] sm:$0xff]  ;;  %v594_v5 = vld [vmem:[#allocation8 + $0x160] sm:$0xff] }
  0xb9   :  { %v657_v19 = vmul.f32 %v1127_v7, %v2830_v55  ;;  %v699_v52 = vsub.f32 %v2831_v8, %v687_v58  ;;  %v680_v17 = vmul.f32 0.5, %v656_v43  ;;  %v2148_v36 = vadd.f32 %v694_v14, %v586_v33 }
  0xba   :  { %v700_v31 = vsub.f32 %v2832_v4, %v688_v2  ;;  %v691_v57 = vmul.f32 %v679_v40, %v655_v21  ;;  %v2833_v47 = vsub.f32 -0.9189385, %v1978_v10  ;;  %v2152_v44 = vadd.f32 %v695_v16, %v587_v11  ;;  %v595_v16 = vld [vmem:[#allocation8 + $0x168] sm:$0xff]  ;;  %v596_v11 = vld [vmem:[#allocation8 + $0x170] sm:$0xff] }
  0xbb   :  { %v681_v22 = vmul.f32 0.5, %v657_v19  ;;  %v692_v38 = vmul.f32 %v680_v17, %v656_v43  ;;  %v2834_v35 = vsub.f32 -0.9189385, %v1985_v62  ;;  %v2156_v6 = vadd.f32 %v696_v0, %v588_v1  ;;  %v597_v1 = vld [vmem:[#allocation8 + $0x178] sm:$0xff] }
  0xbc   :  { %v701_v7 = vsub.f32 %v2833_v47, %v689_v12  ;;  %v2158_v9 = vadd.f32 %v697_v24, %v589_v41  ;;  %v2835_v33 = vsub.f32 -0.9189385, %v1987_v59  ;;  %v2162_v21 = vadd.f32 %v698_v39, %v590_v60 }
  0xbd   :  { %v702_v58 = vsub.f32 %v2834_v35, %v690_v45  ;;  %v693_v14 = vmul.f32 %v681_v22, %v657_v19  ;;  %v2164_v10 = vadd.f32 %v699_v52, %v591_v18  ;;  %v2836_v43 = vsub.f32 -0.9189385, %v2767_v13 }
  0xbe   :  { %v703_v42 = vsub.f32 %v2835_v33, %v691_v57  ;;  %v2168_v62 = vadd.f32 %v700_v31, %v592_v51  ;;  %v2837_v0 = vmax.f32 %v2785_v49, %v2784_v25  ;;  %v2838_v59 = vmax.f32 %v2787_v15, %v2786_v53  ;;  %v2842_v31 = vld [vmem:[#allocation42_spill] sm:$0xff]  ;;  %v2844_v57 = vld [vmem:[#allocation44_spill] sm:$0xff] }
  0xbf   :  { %v704_v2 = vsub.f32 %v2836_v43, %v692_v38  ;;  %v2839_v41 = vsub.f32 -0.9189385, %v2768_v63  ;;  %v2180_v19 = vadd.f32 %v701_v7, %v593_v26  ;;  %v2184_v13 = vmax.f32 %v2085_v34, %v2148_v36  ;;  %v2845_v7 = vld [vmem:[#allocation45_spill] sm:$0xff]  ;;  %v2848_v33 = vld [vmem:[#allocation48_spill] sm:$0xff] }
  0xc0   :  { %v738_v24 = vmax.f32 %v2837_v0, %v2034_v54  ;;  %v739_v39 = vmax.f32 %v2838_v59, %v2036_v56  ;;  %v2188_v40 = vmax.f32 %v2088_v23, %v2152_v44  ;;  %v2190_v12 = vadd.f32 %v702_v58, %v594_v5  ;;  %v2847_v5 = vld [vmem:[#allocation47_spill] sm:$0xff]  ;;  %v2849_v0 = vld [vmem:[#allocation49_spill] sm:$0xff] }
  0xc1   :  { %v705_v55 = vsub.f32 %v2839_v41, %v693_v14  ;;  %v2194_v8 = vmax.f32 %v2094_v61, %v2156_v6  ;;  %v2198_v63 = vmax.f32 %v2097_v46, %v2158_v9  ;;  %v2202_v52 = vmax.f32 %v2103_v20, %v2162_v21 }
  0xc2   :  { %v2204_v34 = vadd.f32 %v703_v42, %v595_v16  ;;  %v2206_v60 = vadd.f32 %v704_v2, %v596_v11  ;;  %v2840_v23 = vmax.f32 %v2789_v50, %v2788_v37  ;;  %v2214_v61 = vmax.f32 %v2106_v27, %v2164_v10  ;;  %v2843_v27 = vld [vmem:[#allocation43_spill] sm:$0xff] }
  0xc3   :  { %v2216_v17 = vadd.f32 %v705_v55, %v597_v1  ;;  %v2841_v46 = vmax.f32 %v2794_v28, %v2793_v32  ;;  %v2224_v45 = vmax.f32 %v2112_v30, %v2168_v62  ;;  %v754_v4 = vsub.f32 %v2764_v48, %v2184_v13  ;;  %v2846_v30 = vld [vmem:[#allocation46_spill] sm:$0xff] }
  0xc4   :  { %v740_v18 = vmax.f32 %v2840_v23, %v2038_v29  ;;  %v2230_v51 = vmax.f32 %v2842_v31, %v2180_v19  ;;  %v755_v22 = vsub.f32 %v2843_v27, %v2188_v40  ;;  %v756_v47 = vsub.f32 %v2844_v57, %v2194_v8 }
  0xc5   :  { %v741_v20 = vmax.f32 %v2841_v46, %v2040_v3  ;;  %v757_v26 = vsub.f32 %v2845_v7, %v2198_v63  ;;  %v2239_v38 = vmax.f32 %v738_v24, %v2190_v12  ;;  %v758_v35 = vsub.f32 %v2846_v30, %v2202_v52  ;;  %v2854_v30 = vld [vmem:[#allocation37_spill] sm:$0xff] }
  0xc6   :  { %v2244_v48 = vmax.f32 %v739_v39, %v2204_v34  ;;  %v2247_v58 = vmax.f32 %v740_v18, %v2206_v60  ;;  %v759_v14 = vsub.f32 %v2847_v5, %v2214_v61  ;;  %v760_v42 = vsub.f32 %v2848_v33, %v2224_v45 }
  0xc7   :  { %v766_v16 = vmul.f32 1.442695, %v754_v4  ;;  %v768_v11 = vmul.f32 1.442695, %v755_v22  ;;  %v770_v43 = vmul.f32 1.442695, %v756_v47  ;;  %v2254_v2 = vmax.f32 %v741_v20, %v2216_v17 }
  0xc8   :  { %v761_v24 = vsub.f32 %v2849_v0, %v2230_v51  ;;  %v772_v59 = vmul.f32 1.442695, %v757_v26  ;;  %v762_v39 = vsub.f32 %v2785_v49, %v2239_v38  ;;  %v774_v1 = vmul.f32 1.442695, %v758_v35  ;;  %v2850_v49 = vld [vmem:[#allocation33_spill] sm:$0xff] }
  0xc9   :  { %1128 = vpow2.f32 %v766_v16  ;;  %v763_v41 = vsub.f32 %v2787_v15, %v2244_v48  ;;  %v776_v55 = vmul.f32 1.442695, %v759_v14  ;;  %v764_v23 = vsub.f32 %v2789_v50, %v2247_v58  ;;  %v2851_v15 = vld [vmem:[#allocation34_spill] sm:$0xff]  ;;  %v2852_v50 = vld [vmem:[#allocation35_spill] sm:$0xff]  ;;  %v2856_v16 = vld [vmem:[#allocation60_spill] sm:$0xff] }
  0xca   :  { %1130 = vpow2.f32 %v768_v11  ;;  %v778_v18 = vmul.f32 1.442695, %v760_v42  ;;  %v765_v46 = vsub.f32 %v2794_v28, %v2254_v2  ;;  %v780_v20 = vmul.f32 1.442695, %v761_v24  ;;  %v2853_v28 = vld [vmem:[#allocation36_spill] sm:$0xff]  ;;  %v2855_v14 = vld [vmem:[#allocation38_spill] sm:$0xff] }
  0xcb   :  { %1132 = vpow2.f32 %v770_v43  ;;  %v782_v4 = vmul.f32 1.442695, %v762_v39  ;;  %v802_v31 = vsub.f32 %v2850_v49, %v2184_v13  ;;  %v784_v27 = vmul.f32 1.442695, %v763_v41  ;;  %v2857_v0 = vld [vmem:[#allocation61_spill] sm:$0xff] }
  0xcc   :  { %1134 = vpow2.f32 %v772_v59  ;;  %v803_v22 = vsub.f32 %v2851_v15, %v2188_v40  ;;  %v786_v57 = vmul.f32 1.442695, %v764_v23  ;;  %v804_v47 = vsub.f32 %v2852_v50, %v2194_v8 }
  0xcd   :  { %1136 = vpow2.f32 %v774_v1  ;;  %v788_v7 = vmul.f32 1.442695, %v765_v46  ;;  %v805_v26 = vsub.f32 %v2853_v28, %v2198_v63  ;;  %v806_v35 = vsub.f32 %v2854_v30, %v2202_v52 }
  0xce   :  { %1138 = vpow2.f32 %v776_v55  ;;  %v814_v5 = vmul.f32 1.442695, %v802_v31  ;;  %v807_v33 = vsub.f32 %v2855_v14, %v2214_v61  ;;  %v816_v42 = vmul.f32 1.442695, %v803_v22 }
  0xcf   :  { %1140 = vpow2.f32 %v778_v18  ;;  %v808_v11 = vsub.f32 %v2856_v16, %v2224_v45  ;;  %v818_v43 = vmul.f32 1.442695, %v804_v47  ;;  %v809_v24 = vsub.f32 %v2857_v0, %v2230_v51 }
  0xd0   :  { %1142 = vpow2.f32 %v780_v20  ;;  %v820_v59 = vmul.f32 1.442695, %v805_v26  ;;  %v810_v39 = vsub.f32 %v2784_v25, %v2239_v38  ;;  %v822_v1 = vmul.f32 1.442695, %v806_v35  ;;  %v2861_v35 = vld [vmem:[#allocation39_spill] sm:$0xff] }
  0xd1   :  { %1144 = vpow2.f32 %v782_v4  ;;  %v811_v55 = vsub.f32 %v2786_v53, %v2244_v48  ;;  %v824_v23 = vmul.f32 1.442695, %v807_v33  ;;  %v812_v46 = vsub.f32 %v2788_v37, %v2247_v58  ;;  %v2862_v33 = vld [vmem:[#allocation40_spill] sm:$0xff] }
  0xd2   :  { %1146 = vpow2.f32 %v784_v27  ;;  %v826_v20 = vmul.f32 1.442695, %v808_v11  ;;  %v813_v25 = vsub.f32 %v2793_v32, %v2254_v2  ;;  %v828_v49 = vmul.f32 1.442695, %v809_v24  ;;  %v2858_v27 = vld [vmem:[#allocation55_spill] sm:$0xff] }
  0xd3   :  { %1148 = vpow2.f32 %v786_v57  ;;  %v830_v53 = vmul.f32 1.442695, %v810_v39  ;;  %v850_v15 = vsub.f32 %v2858_v27, %v2184_v13  ;;  %v832_v37 = vmul.f32 1.442695, %v811_v55  ;;  %v2859_v57 = vld [vmem:[#allocation56_spill] sm:$0xff]  ;;  %v2864_v39 = vld [vmem:[#allocation27_spill] sm:$0xff] }
  0xd4   :  { %1150 = vpow2.f32 %v788_v7  ;;  %v851_v50 = vsub.f32 %v2859_v57, %v2188_v40  ;;  %v834_v32 = vmul.f32 1.442695, %v812_v46  ;;  %v2860_v7 = vld [vmem:[#allocation59_spill] sm:$0xff]  ;;  %v836_v30 = vmul.f32 1.442695, %v813_v25  ;;  %v2865_v46 = vld [vmem:[#allocation72_spill] sm:$0xff] }
  0xd5   :  { %1152 = vpow2.f32 %v814_v5  ;;  %v852_v28 = vsub.f32 %v2860_v7, %v2194_v8  ;;  %v853_v5 = vsub.f32 %v2861_v35, %v2198_v63  ;;  %v862_v16 = vmul.f32 1.442695, %v850_v15 }
  0xd6   :  { %v2284_v41 = vpop.eup %1128  ;;  %1154 = vpow2.f32 %v816_v42  ;;  %v854_v42 = vsub.f32 %v2862_v33, %v2202_v52  ;;  %v864_v24 = vmul.f32 1.442695, %v851_v50 }
  0xd7   :  { %v2288_v18 = vpop.eup %1130  ;;  %1156 = vpow2.f32 %v818_v43  ;;  %v2863_v43 = vld [vmem:[#allocation41_spill] sm:$0xff]  ;;  %v866_v55 = vmul.f32 1.442695, %v852_v28  ;;  %v868_v25 = vmul.f32 1.442695, %v853_v5  ;;  %v898_v5 = vsub.f32 %v2148_v36, %v2184_v13 }
  0xd8   :  { %v2292_v4 = vpop.eup %1132  ;;  %1158 = vpow2.f32 %v820_v59  ;;  %v855_v0 = vsub.f32 %v2863_v43, %v2214_v61  ;;  %v870_v27 = vmul.f32 1.442695, %v854_v42  ;;  %v899_v42 = vsub.f32 %v2152_v44, %v2188_v40 }
  0xd9   :  { %v2296_v31 = vpop.eup %1134  ;;  %1160 = vpow2.f32 %v822_v1  ;;  %v856_v1 = vsub.f32 %v2864_v39, %v2224_v45  ;;  %v900_v43 = vsub.f32 %v2156_v6, %v2194_v8  ;;  %v901_v36 = vsub.f32 %v2158_v9, %v2198_v63 }
  0xda   :  { %v2300_v22 = vpop.eup %1136  ;;  %1162 = vpow2.f32 %v824_v23  ;;  %v872_v57 = vmul.f32 1.442695, %v855_v0  ;;  %v902_v44 = vsub.f32 %v2162_v21, %v2202_v52  ;;  %v903_v6 = vsub.f32 %v2164_v10, %v2214_v61 }
  0xdb   :  { %v2304_v47 = vpop.eup %1138  ;;  %1164 = vpow2.f32 %v826_v20  ;;  %v857_v20 = vsub.f32 %v2865_v46, %v2230_v51  ;;  %v874_v7 = vmul.f32 1.442695, %v856_v1  ;;  %v910_v1 = vmul.f32 1.442695, %v898_v5 }
  0xdc   :  { %v2308_v26 = vpop.eup %1140  ;;  %1166 = vpow2.f32 %v828_v49  ;;  %v912_v46 = vmul.f32 1.442695, %v899_v42  ;;  %v904_v9 = vsub.f32 %v2168_v62, %v2224_v45  ;;  %v905_v21 = vsub.f32 %v2180_v19, %v2230_v51 }
  0xdd   :  { %v2312_v14 = vpop.eup %1142  ;;  %1168 = vpow2.f32 %v830_v53  ;;  %v858_v53 = vsub.f32 %v2034_v54, %v2239_v38  ;;  %v861_v54 = vsub.f32 %v2040_v3, %v2254_v2  ;;  %v906_v10 = vsub.f32 %v2190_v12, %v2239_v38 }
  0xde   :  { %v2316_v11 = vpop.eup %1144  ;;  %1170 = vpow2.f32 %v832_v37  ;;  %v859_v37 = vsub.f32 %v2036_v56, %v2244_v48  ;;  %v920_v62 = vmul.f32 1.442695, %v903_v6  ;;  %v922_v19 = vmul.f32 1.442695, %v904_v9 }
  0xdf   :  { %v2320_v59 = vpop.eup %1146  ;;  %1172 = vpow2.f32 %v834_v32  ;;  %v860_v32 = vsub.f32 %v2038_v29, %v2247_v58  ;;  %v878_v56 = vmul.f32 1.442695, %v858_v53  ;;  %v909_v5 = vsub.f32 %v2216_v17, %v2254_v2 }
  0xe0   :  { %v2324_v23 = vpop.eup %1148  ;;  %1174 = vpow2.f32 %v836_v30  ;;  %v876_v30 = vmul.f32 1.442695, %v857_v20  ;;  %v880_v29 = vmul.f32 1.442695, %v859_v37  ;;  %v924_v12 = vmul.f32 1.442695, %v905_v21 }
  0xe1   :  { %v2328_v49 = vpop.eup %1150  ;;  %1176 = vpow2.f32 %v862_v16  ;;  %v882_v3 = vmul.f32 1.442695, %v860_v32  ;;  %v926_v42 = vmul.f32 1.442695, %v906_v10  ;;  %v932_v17 = vmul.f32 1.442695, %v909_v5 }
  0xe2   :  { %v2332_v15 = vpop.eup %1152  ;;  %1178 = vpow2.f32 %v864_v24  ;;  %v884_v24 = vmul.f32 1.442695, %v861_v54 }
  0xe3   :  { %v2336_v50 = vpop.eup %1154  ;;  %1180 = vpow2.f32 %v866_v55 }
  0xe4   :  { %v2340_v28 = vpop.eup %1156  ;;  %1182 = vpow2.f32 %v868_v25  ;;  %v914_v25 = vmul.f32 1.442695, %v900_v43 }
  0xe5   :  { %v2344_v35 = vpop.eup %1158  ;;  %1184 = vpow2.f32 %v870_v27  ;;  %v916_v27 = vmul.f32 1.442695, %v901_v36  ;;  %v840_v6 = vadd.f32 %v2340_v28, %v2292_v4 }
  0xe6   :  { %v2348_v33 = vpop.eup %1160  ;;  %1186 = vpow2.f32 %v872_v57  ;;  %v918_v57 = vmul.f32 1.442695, %v902_v44  ;;  %v839_v44 = vadd.f32 %v2336_v50, %v2288_v18  ;;  %v841_v9 = vadd.f32 %v2344_v35, %v2296_v31 }
  0xe7   :  { %v2352_v16 = vpop.eup %1162  ;;  %1188 = vpow2.f32 %v874_v7  ;;  %v907_v7 = vsub.f32 %v2204_v34, %v2244_v48 }
  0xe8   :  { %v2356_v0 = vpop.eup %1164  ;;  %1190 = vpow2.f32 %v876_v30  ;;  %v908_v30 = vsub.f32 %v2206_v60, %v2247_v58  ;;  %v843_v18 = vadd.f32 %v2352_v16, %v2304_v47 }
  0xe9   :  { %v2360_v39 = vpop.eup %1166  ;;  %1192 = vpow2.f32 %v878_v56  ;;  %v928_v34 = vmul.f32 1.442695, %v907_v7  ;;  %v844_v4 = vadd.f32 %v2356_v0, %v2308_v26 }
  0xea   :  { %v2364_v55 = vpop.eup %1168  ;;  %1194 = vpow2.f32 %v880_v29  ;;  %v930_v60 = vmul.f32 1.442695, %v908_v30  ;;  %v845_v31 = vadd.f32 %v2360_v39, %v2312_v14 }
  0xeb   :  { %v2368_v20 = vpop.eup %1170  ;;  %1196 = vpow2.f32 %v882_v3 }
  0xec   :  { %v2372_v53 = vpop.eup %1172  ;;  %1198 = vpow2.f32 %v884_v24  ;;  %v838_v24 = vadd.f32 %v2332_v15, %v2284_v41  ;;  %v842_v41 = vadd.f32 %v2348_v33, %v2300_v22  ;;  %v846_v22 = vadd.f32 %v2364_v55, %v2316_v11 }
  0xed   :  { %v2376_v37 = vpop.eup %1174  ;;  %1200 = vpow2.f32 %v910_v1  ;;  %v847_v47 = vadd.f32 %v2368_v20, %v2320_v59  ;;  %v848_v26 = vadd.f32 %v2372_v53, %v2324_v23 }
  0xee   :  { %v1177_v32 = vpop.eup %1176  ;;  %1202 = vpow2.f32 %v912_v46  ;;  %v849_v39 = vadd.f32 %v2376_v37, %v2328_v49 }
  0xef   :  { %v1179_v54 = vpop.eup %1178  ;;  %1204 = vpow2.f32 %v914_v25  ;;  %v886_v15 = vadd.f32 %v1177_v32, %v838_v24 }
  0xf0   :  { %v1181_v56 = vpop.eup %1180  ;;  %1206 = vpow2.f32 %v916_v27  ;;  %v887_v50 = vadd.f32 %v1179_v54, %v839_v44 }
  0xf1   :  { %v1183_v29 = vpop.eup %1182  ;;  %1208 = vpow2.f32 %v918_v57  ;;  %v888_v28 = vadd.f32 %v1181_v56, %v840_v6 }
  0xf2   :  { %v1185_v3 = vpop.eup %1184  ;;  %1210 = vpow2.f32 %v920_v62  ;;  %v889_v35 = vadd.f32 %v1183_v29, %v841_v9 }
  0xf3   :  { %v1187_v43 = vpop.eup %1186  ;;  %1212 = vpow2.f32 %v922_v19  ;;  %v890_v33 = vadd.f32 %v1185_v3, %v842_v41 }
  0xf4   :  { %v1189_v36 = vpop.eup %1188  ;;  %1214 = vpow2.f32 %v924_v12  ;;  %v891_v16 = vadd.f32 %v1187_v43, %v843_v18 }
  0xf5   :  { %v1191_v1 = vpop.eup %1190  ;;  %1216 = vpow2.f32 %v926_v42  ;;  %v892_v0 = vadd.f32 %v1189_v36, %v844_v4 }
  0xf6   :  { %v1193_v46 = vpop.eup %1192  ;;  %1218 = vpow2.f32 %v928_v34  ;;  %v893_v11 = vadd.f32 %v1191_v1, %v845_v31 }
  0xf7   :  { %v1195_v25 = vpop.eup %1194  ;;  %1220 = vpow2.f32 %v930_v60  ;;  %v894_v56 = vadd.f32 %v1193_v46, %v846_v22 }
  0xf8   :  { %v1197_v21 = vpop.eup %1196  ;;  %1222 = vpow2.f32 %v932_v17  ;;  %v895_v20 = vadd.f32 %v1195_v25, %v847_v47 }
  0xf9   :  { %v1199_v27 = vpop.eup %1198  ;;  %v896_v23 = vadd.f32 %v1197_v21, %v848_v26 }
  0xfa   :  { %v1201_v10 = vpop.eup %1200  ;;  %v897_v3 = vadd.f32 %v1199_v27, %v849_v39 }
  0xfb   :  { %v1203_v57 = vpop.eup %1202  ;;  %v934_v32 = vadd.f32 %v1201_v10, %v886_v15 }
  0xfc   :  { %v1205_v7 = vpop.eup %1204  ;;  %v935_v62 = vadd.f32 %v1203_v57, %v887_v50 }
  0xfd   :  { %v1207_v54 = vpop.eup %1206  ;;  %v936_v30 = vadd.f32 %v1205_v7, %v888_v28  ;;  %1224 = vlog2.f32 %v934_v32 }
  0xfe   :  { %v1209_v14 = vpop.eup %1208  ;;  %v937_v55 = vadd.f32 %v1207_v54, %v889_v35  ;;  %1226 = vlog2.f32 %v935_v62 }
  0xff   :  { %v1211_v19 = vpop.eup %1210  ;;  %v938_v5 = vadd.f32 %v1209_v14, %v890_v33  ;;  %1228 = vlog2.f32 %v936_v30 }
 0x100   :  { %v1213_v59 = vpop.eup %1212  ;;  %v939_v12 = vadd.f32 %v1211_v19, %v891_v16  ;;  %1230 = vlog2.f32 %v937_v55 }
 0x101   :  { %v1215_v29 = vpop.eup %1214  ;;  %v940_v53 = vadd.f32 %v1213_v59, %v892_v0  ;;  %1232 = vlog2.f32 %v938_v5 }
 0x102   :  { %v1217_v42 = vpop.eup %1216  ;;  %v941_v34 = vadd.f32 %v1215_v29, %v893_v11  ;;  %1234 = vlog2.f32 %v939_v12 }
 0x103   :  { %v1219_v49 = vpop.eup %1218  ;;  %v942_v37 = vadd.f32 %v1217_v42, %v894_v56  ;;  %1236 = vlog2.f32 %v940_v53 }
 0x104   :  { %v1221_v43 = vpop.eup %1220  ;;  %v943_v24 = vadd.f32 %v1219_v49, %v895_v20  ;;  %1238 = vlog2.f32 %v941_v34 }
 0x105   :  { %v1223_v60 = vpop.eup %1222  ;;  %v944_v36 = vadd.f32 %v1221_v43, %v896_v23  ;;  %1240 = vlog2.f32 %v942_v37 }
 0x106   :  { %v945_v44 = vadd.f32 %v1223_v60, %v897_v3  ;;  %1242 = vlog2.f32 %v943_v24 }
 0x107   :  { %1244 = vlog2.f32 %v944_v36 }
 0x108   :  { %1246 = vlog2.f32 %v945_v44 }
 0x10a   :  { %v1225_v17 = vpop.eup %1224 }
 0x10b   :  { %v1227_v1 = vpop.eup %1226  ;;  %v947_v6 = vmul.f32 0.6931472, %v1225_v17 }
 0x10c   :  { %v1229_v46 = vpop.eup %1228  ;;  %v949_v9 = vmul.f32 0.6931472, %v1227_v1 }
 0x10d   :  { %v1231_v25 = vpop.eup %1230  ;;  %v951_v41 = vmul.f32 0.6931472, %v1229_v46  ;;  %v970_v15 = vadd.f32 %v947_v6, %v2184_v13 }
 0x10e   :  { %v1233_v21 = vpop.eup %1232  ;;  %v953_v18 = vmul.f32 0.6931472, %v1231_v25  ;;  %v971_v50 = vadd.f32 %v949_v9, %v2188_v40 }
 0x10f   :  { %v1235_v27 = vpop.eup %1234  ;;  %v955_v4 = vmul.f32 0.6931472, %v1233_v21  ;;  %v972_v28 = vadd.f32 %v951_v41, %v2194_v8  ;;  %v982_v10 = vsub.f32 0.0, %v970_v15 }
 0x110   :  { %v1237_v31 = vpop.eup %1236  ;;  %v957_v35 = vmul.f32 0.6931472, %v1235_v27  ;;  %v973_v57 = vadd.f32 %v953_v18, %v2198_v63  ;;  %v983_v22 = vsub.f32 0.0, %v971_v50 }
 0x111   :  { %v1239_v33 = vpop.eup %1238  ;;  %v959_v32 = vmul.f32 0.6931472, %v1237_v31  ;;  %v974_v7 = vadd.f32 %v955_v4, %v2202_v52  ;;  %v984_v47 = vsub.f32 0.0, %v972_v28  ;;  %994 = vst [vmem:[#allocation10] sm:$0xff] %v982_v10 }
 0x112   :  { %v1241_v13 = vpop.eup %1240  ;;  %v961_v16 = vmul.f32 0.6931472, %v1239_v33  ;;  %v975_v40 = vadd.f32 %v957_v35, %v2214_v61  ;;  %v985_v62 = vsub.f32 0.0, %v973_v57  ;;  %995 = vst [vmem:[#allocation10 + $0x8] sm:$0xff] %v983_v22 }
 0x113   :  { %v1243_v54 = vpop.eup %1242  ;;  %v963_v8 = vmul.f32 0.6931472, %v1241_v13  ;;  %v976_v26 = vadd.f32 %v959_v32, %v2224_v45  ;;  %v986_v0 = vsub.f32 0.0, %v974_v7  ;;  %996 = vst [vmem:[#allocation10 + $0x10] sm:$0xff] %v984_v47 }
 0x114   :  { %v1245_v63 = vpop.eup %1244  ;;  %v965_v30 = vmul.f32 0.6931472, %v1243_v54  ;;  %v977_v14 = vadd.f32 %v961_v16, %v2230_v51  ;;  %v987_v39 = vsub.f32 0.0, %v975_v40  ;;  %997 = vst [vmem:[#allocation10 + $0x18] sm:$0xff] %v985_v62 }
 0x115   :  { %v1247_v52 = vpop.eup %1246  ;;  %v967_v11 = vmul.f32 0.6931472, %v1245_v63  ;;  %v978_v55 = vadd.f32 %v963_v8, %v2239_v38  ;;  %v988_v19 = vsub.f32 0.0, %v976_v26  ;;  %998 = vst [vmem:[#allocation10 + $0x20] sm:$0xff] %v986_v0 }
 0x116   :  { %v969_v61 = vmul.f32 0.6931472, %v1247_v52  ;;  %v979_v56 = vadd.f32 %v965_v30, %v2244_v48  ;;  %v989_v5 = vsub.f32 0.0, %v977_v14  ;;  %999 = vst [vmem:[#allocation10 + $0x28] sm:$0xff] %v987_v39 }
 0x117   :  { %v980_v45 = vadd.f32 %v967_v11, %v2247_v58  ;;  %v990_v59 = vsub.f32 0.0, %v978_v55  ;;  %1000 = vst [vmem:[#allocation10 + $0x30] sm:$0xff] %v988_v19 }
 0x118   :  { %v981_v51 = vadd.f32 %v969_v61, %v2254_v2  ;;  %v991_v20 = vsub.f32 0.0, %v979_v56  ;;  %1001 = vst [vmem:[#allocation10 + $0x38] sm:$0xff] %v989_v5 }
 0x119   :  { %v992_v12 = vsub.f32 0.0, %v980_v45  ;;  %1002 = vst [vmem:[#allocation10 + $0x40] sm:$0xff] %v990_v59 }
 0x11a   :  { %v993_v38 = vsub.f32 0.0, %v981_v51  ;;  %1003 = vst [vmem:[#allocation10 + $0x48] sm:$0xff] %v991_v20 }
 0x11b   :  { %1004 = vst [vmem:[#allocation10 + $0x50] sm:$0xff] %v992_v12 }
 0x11c   :  { %1005 = vst [vmem:[#allocation10 + $0x58] sm:$0xff] %v993_v38 }
 0x11d   :  { %1339 = shalt.err (!%p1336_p10)
}
 0x11e   :  { %1017 = dma.vmem_to_hbm [thread:$0]  %s1012_s3, 1536, %s2432_s4, [#allocation4], %s1358_s20, %s1358_s20, %s1359_s21  }
 0x11f   :  { %1354 = dma.done.wait [#allocation4], 1536  }
 0x120   :  { %1355 = vsyncadd [#allocation4], 4294965760 }
 0x121   :  { %1021 = vsyncpa [#allocation3], 1 }
 0x122   :  { %1022 = vsyncpa [#allocation6], 1 }
 0x123   :  { %1023 = vsyncpa [#allocation9], 1 }
 0x124   :  { %1024 = vsyncpa [#allocation4], 1 }

</bundles_post_ra>
